<compile_context>
chip_gen: v6e
topology: v6e:2x2x1
jax: 0.10.0
libtpu: 0.0.40
codegen_flags: <defaults>
</compile_context>

<pallas_src>
import functools

import jax
import jax.numpy as jnp
from jax import lax
from jax.experimental import pallas as pl
from jax.experimental.pallas import tpu as pltpu


# ----------------------------------------------------------------------------- helpers
def _gelu(x):
    # tanh-approx GELU
    c = jnp.asarray(0.7978845608028654, x.dtype)  # sqrt(2/pi)
    return 0.5 * x * (1.0 + jnp.tanh(c * (x + 0.044715 * x * x * x)))


def _block_diag(a, b):
    z1 = jnp.zeros((a.shape[0], b.shape[1]), a.dtype)
    z2 = jnp.zeros((b.shape[0], a.shape[1]), b.dtype)
    top = jnp.concatenate([a, z1], axis=1)
    bot = jnp.concatenate([z2, b], axis=1)
    return jnp.concatenate([top, bot], axis=0)


# ----------------------------------------------------------------------------- fused kernel
def clip_fused_kernel(patches_ref, img_w_ref, img_b_ref,
                      tok_ref, w_pool_ref, txt_w_ref, txt_b_ref,
                      w1_ref, b1_ref, w2_ref, b2_ref,
                      ig_ref, ibt_ref, tg_ref, tbt_ref,
                      out_ref, *, batch, n_patches, proj_dim, temperature):
    f32 = jnp.float32
    bf16 = jnp.bfloat16
    P = proj_dim

    # ---------------- image encoder: one [B*N, Kp] @ [Kp, P] bf16 matmul (MXU)
    h = jnp.dot(patches_ref[...], img_w_ref[...],
                preferred_element_type=f32)                         # [B*N, P]
    h = jnp.maximum(h + img_b_ref[...], 0.0)                        # ReLU
    h = h.reshape(batch, n_patches, P)
    image_encoded = jnp.mean(h, axis=1)                             # [B, P]

    # ---------------- text encoder: (precomputed) masked mean -> Linear -> GELU
    pooled = jnp.sum(tok_ref[...] * w_pool_ref[...][:, :, None], axis=1)  # [B, P]
    caption = _gelu(jnp.dot(pooled.astype(bf16), txt_w_ref[...],
                            preferred_element_type=f32) + txt_b_ref[...])

    # ---------------- both projection heads as ONE stacked matmul per layer
    # x_stack rows 0..B-1 = [image_encoded | 0], rows B..2B-1 = [0 | caption];
    # block-diagonal [2P, 2P] weights keep the two heads independent.  The
    # off-diagonal halves of the outputs are garbage and never read.
    zeros = jnp.zeros((batch, P), f32)
    x_stack = jnp.concatenate(
        [jnp.concatenate([image_encoded, zeros], axis=1),
         jnp.concatenate([zeros, caption], axis=1)], axis=0)        # [2B, 2P]
    projected = jnp.dot(x_stack.astype(bf16), w1_ref[...],
                        preferred_element_type=f32) + b1_ref[...]   # [2B, 2P]
    y = (jnp.dot(_gelu(projected).astype(bf16), w2_ref[...],
                 preferred_element_type=f32) + b2_ref[...] + projected)
    y_img = y[:batch, :P]                                           # [B, P]
    y_txt = y[batch:, P:]                                           # [B, P]

    def layer_norm(v, gamma, beta):
        mu = jnp.mean(v, axis=-1, keepdims=True)
        var = jnp.mean((v - mu) * (v - mu), axis=-1, keepdims=True)
        return (v - mu) * lax.rsqrt(var + 1e-5) * gamma + beta

    img_emb = layer_norm(y_img, ig_ref[...], ibt_ref[...])
    txt_emb = layer_norm(y_txt, tg_ref[...], tbt_ref[...])

    # ---------------- contrastive loss (single logits matmul, no transposes)
    inv_t = jnp.asarray(1.0 / temperature, f32)
    img_u = img_emb * lax.rsqrt(jnp.sum(img_emb * img_emb, axis=1, keepdims=True) + 1e-12)
    txt_u = txt_emb * lax.rsqrt(jnp.sum(txt_emb * txt_emb, axis=1, keepdims=True) + 1e-12)

    dn = (((1,), (1,)), ((), ()))                                   # 'nt' contraction
    logits_t = lax.dot_general(txt_u.astype(bf16),
                               (img_u * inv_t).astype(bf16), dn,
                               preferred_element_type=f32)          # [B,B] rows=text

    # sym := (logits_i + logits_t)/2 * T  with logits_i == logits_t^T by
    # definition.  Computed structurally symmetric with a single stacked-K
    # matmul (no transpose, no reliance on bitwise equality of two matmuls):
    #   sym[i,j] = 0.5 * (txt_u[i]·img_u[j] + img_u[i]·txt_u[j])
    lhs = jnp.concatenate([txt_u, img_u], axis=1).astype(bf16)      # [B, 2P]
    rhs = jnp.concatenate([img_u, txt_u], axis=1).astype(bf16)      # [B, 2P]
    sym = 0.5 * lax.dot_general(lhs, rhs, dn, preferred_element_type=f32)

    # soft targets: row softmax of sym (exact normalization)
    e_r = jnp.exp(sym - jnp.max(sym, axis=-1, keepdims=True))
    targets = e_r * pl.reciprocal(jnp.sum(e_r, axis=-1, keepdims=True), approx=False)

    def lsm_row(z):
        zz = z - jnp.max(z, axis=-1, keepdims=True)
        return zz - jnp.log(jnp.sum(jnp.exp(zz), axis=-1, keepdims=True))

    def lsm_col(z):
        zz = z - jnp.max(z, axis=0, keepdims=True)
        return zz - jnp.log(jnp.sum(jnp.exp(zz), axis=0, keepdims=True))

    # texts_loss[b]  = -sum_j targets[b,j] * log_softmax(logits_t)[b,j]
    # images_loss[c] = -sum_j targets^T[c,j] * log_softmax(logits_t^T)[c,j]
    #                = -sum_j targets[j,c] * col_log_softmax(logits_t)[j,c]
    texts_loss = -jnp.sum(targets * lsm_row(logits_t), axis=-1, keepdims=True)   # [B,1]
    images_loss = -jnp.sum(targets * lsm_col(logits_t), axis=0, keepdims=True)   # [1,B]
    loss = 0.5 * (jnp.mean(texts_loss) + jnp.mean(images_loss))
    out_ref[0, 0] = loss                                            # scalar -> SMEM


# ----------------------------------------------------------------------------- wrapper
def clip_forward(params, image, input_ids, attention_mask, temperature):
    B, C, H, W = image.shape
    p = params["patch"]
    n_patches = (H // p) * (W // p)
    dp = C * p * p
    dp_pad = ((dp + 127) // 128) * 128          # pad K to a lane multiple (192->256)

    # NCHW -> [B*N_patches, dp_pad] in bf16 (pure-JAX glue; lane-dense 2-D form)
    patches = image.reshape(B, C, H // p, p, W // p, p)
    patches = patches.transpose(0, 2, 4, 1, 3, 5).reshape(B * n_patches, dp)
    patches = jnp.pad(patches.astype(jnp.float32),
                      ((0, 0), (0, dp_pad - dp))).astype(jnp.bfloat16)
    img_w = jnp.pad(params["img_w"], ((0, dp_pad - dp), (0, 0))).astype(jnp.bfloat16)

    # embedding lookup (gather) + pooling weights in JAX glue
    tok = jnp.take(params["tok_embed"], input_ids, axis=0)                  # f32
    mask = attention_mask.astype(jnp.float32)
    w_pool = mask / jnp.maximum(jnp.sum(mask, axis=1, keepdims=True), 1.0)  # f32

    ip, tp = params["img_proj"], params["txt_proj"]
    # block-diagonal stacked projection-head weights (bf16), concatenated biases
    w1_bd = _block_diag(ip["w1"], tp["w1"]).astype(jnp.bfloat16)            # [2P,2P]
    w2_bd = _block_diag(ip["w2"], tp["w2"]).astype(jnp.bfloat16)
    b1_cat = jnp.concatenate([ip["b1"], tp["b1"]], axis=1)                  # [1,2P]
    b2_cat = jnp.concatenate([ip["b2"], tp["b2"]], axis=1)
    txt_w = params["txt_w"].astype(jnp.bfloat16)
    proj_dim = ip["w1"].shape[1]

    kernel = functools.partial(clip_fused_kernel, batch=B, n_patches=n_patches,
                               proj_dim=proj_dim, temperature=float(temperature))
    vmem = pltpu.MemorySpace.VMEM
    out = pl.pallas_call(
        kernel,
        out_shape=jax.ShapeDtypeStruct((1, 1), jnp.float32),
        in_specs=[pl.BlockSpec(memory_space=vmem)] * 15,
        out_specs=pl.BlockSpec(memory_space=pltpu.MemorySpace.SMEM),
    )(patches, img_w, params["img_b"],
      tok, w_pool, txt_w, params["txt_b"],
      w1_bd, b1_cat, w2_bd, b2_cat,
      ip["gamma"], ip["beta"], tp["gamma"], tp["beta"])
    return out[0, 0]


# ----------------------------------------------------------------------------- reference (pure JAX, f32)
def clip_forward_ref(params, image, input_ids, attention_mask, temperature):
    B, C, H, W = image.shape
    p = params["patch"]
    patches = image.reshape(B, C, H // p, p, W // p, p)
    patches = patches.transpose(0, 2, 4, 1, 3, 5).reshape(B, (H // p) * (W // p), C * p * p)
    patches = patches.astype(jnp.float32)

    h = jnp.maximum(jnp.einsum("bnd,de->bne", patches, params["img_w"]) + params["img_b"][None], 0.0)
    image_encoded = jnp.mean(h, axis=1)

    tok = jnp.take(params["tok_embed"], input_ids, axis=0)
    m = attention_mask.astype(jnp.float32)
    pooled = jnp.sum(tok * m[:, :, None], axis=1) / jnp.sum(m, axis=1, keepdims=True)
    caption_features = _gelu(pooled @ params["txt_w"] + params["txt_b"])

    def proj(x, pr):
        projected = x @ pr["w1"] + pr["b1"]
        y = _gelu(projected) @ pr["w2"] + pr["b2"] + projected
        mu = jnp.mean(y, axis=-1, keepdims=True)
        var = jnp.mean((y - mu) ** 2, axis=-1, keepdims=True)
        return (y - mu) / jnp.sqrt(var + 1e-5) * pr["gamma"] + pr["beta"]

    ie = proj(image_encoded, params["img_proj"])
    te = proj(caption_features, params["txt_proj"])
    ie = ie / jnp.linalg.norm(ie, axis=1, keepdims=True)
    te = te / jnp.linalg.norm(te, axis=1, keepdims=True)
    ie = ie / temperature
    logits_t = te @ ie.T
    logits_i = ie @ te.T
    targets = jax.nn.softmax((logits_i + logits_t) / 2 * temperature, axis=-1)
    lp_t = jax.nn.log_softmax(logits_t, axis=-1)
    lp_i = jax.nn.log_softmax(logits_i, axis=-1)
    texts_loss = -jnp.sum(targets * lp_t, axis=-1)
    images_loss = -jnp.sum(targets.T * lp_i, axis=-1)
    return jnp.mean((images_loss + texts_loss) / 2.0)


# ----------------------------------------------------------------------------- setup & main
def init_params(key, *, C=3, patch=8, image_embeddings=128, vocab=256,
                embed_dim=128, text_embeddings=128, projection_dim=128):
    # feature dims kept at 128 so every kernel last-dim is lane-dense
    ks = jax.random.split(key, 12)
    dp = C * patch * patch

    def dense(k, din, dout, scale=0.05):
        return scale * jax.random.normal(k, (din, dout), jnp.float32)

    def proj_head(k1, k2, din, pdim):
        return {
            "w1": dense(k1, din, pdim),
            "b1": jnp.zeros((1, pdim), jnp.float32),
            "w2": dense(k2, pdim, pdim),
            "b2": jnp.zeros((1, pdim), jnp.float32),
            "gamma": jnp.ones((1, pdim), jnp.float32),
            "beta": jnp.zeros((1, pdim), jnp.float32),
        }

    return {
        "patch": patch,
        "img_w": dense(ks[0], dp, image_embeddings),
        "img_b": jnp.zeros((1, image_embeddings), jnp.float32),
        "tok_embed": 0.05 * jax.random.normal(ks[1], (vocab, embed_dim), jnp.float32),
        "txt_w": dense(ks[2], embed_dim, text_embeddings),
        "txt_b": jnp.zeros((1, text_embeddings), jnp.float32),
        "img_proj": proj_head(ks[3], ks[4], image_embeddings, projection_dim),
        "txt_proj": proj_head(ks[5], ks[6], text_embeddings, projection_dim),
    }


if __name__ == "__main__":
    key = jax.random.PRNGKey(0)
    k_param, k_img, k_ids, k_len = jax.random.split(key, 4)

    B, C, H, W = 8, 3, 32, 32
    S, VOCAB = 16, 256
    temperature = 1.0

    params = init_params(k_param, C=C, vocab=VOCAB)

    image = jax.random.normal(k_img, (B, C, H, W), jnp.float32)          # NCHW
    input_ids = jax.random.randint(k_ids, (B, S), 0, VOCAB, jnp.int32)
    lengths = jax.random.randint(k_len, (B, 1), 4, S + 1, jnp.int32)
    attention_mask = (jnp.arange(S)[None, :] < lengths).astype(jnp.int32)

    loss = clip_forward(params, image, input_ids, attention_mask, temperature)
    loss = jax.block_until_ready(loss)

    ref = clip_forward_ref(params, image, input_ids, attention_mask, temperature)
    # bf16 MXU operands vs pure-f32 reference
    assert jnp.abs(loss - ref) < 5e-2, (loss, ref)

    print("KERNEL_OK")
</pallas_src>

<mosaic_0001>
module attributes {stable_mosaic.version = 11 : i64} {
  func.func @clip_fused_kernel(%arg0: memref<128x256xbf16, #tpu.memory_space<vmem>>, %arg1: memref<256x128xbf16, #tpu.memory_space<vmem>>, %arg2: memref<1x128xf32, #tpu.memory_space<vmem>>, %arg3: memref<8x16x128xf32, #tpu.memory_space<vmem>>, %arg4: memref<8x16xf32, #tpu.memory_space<vmem>>, %arg5: memref<128x128xbf16, #tpu.memory_space<vmem>>, %arg6: memref<1x128xf32, #tpu.memory_space<vmem>>, %arg7: memref<256x256xbf16, #tpu.memory_space<vmem>>, %arg8: memref<1x256xf32, #tpu.memory_space<vmem>>, %arg9: memref<256x256xbf16, #tpu.memory_space<vmem>>, %arg10: memref<1x256xf32, #tpu.memory_space<vmem>>, %arg11: memref<1x128xf32, #tpu.memory_space<vmem>>, %arg12: memref<1x128xf32, #tpu.memory_space<vmem>>, %arg13: memref<1x128xf32, #tpu.memory_space<vmem>>, %arg14: memref<1x128xf32, #tpu.memory_space<vmem>>, %arg15: memref<1x1xf32, #tpu.memory_space<smem>>) attributes {dimension_semantics = [], scalar_prefetch = 0 : i64, scratch_operands = 0 : i64, tpu.core_type = #tpu.core_type<tc>} {
    %c0 = arith.constant 0 : index
    %c0_0 = arith.constant 0 : index
    %0 = vector.load %arg0[%c0, %c0_0] : memref<128x256xbf16, #tpu.memory_space<vmem>>, vector<128x256xbf16>
    %c0_1 = arith.constant 0 : index
    %c0_2 = arith.constant 0 : index
    %1 = vector.load %arg1[%c0_1, %c0_2] : memref<256x128xbf16, #tpu.memory_space<vmem>>, vector<256x128xbf16>
    %cst = arith.constant dense<0.000000e+00> : vector<128x128xf32>
    %2 = tpu.matmul %0, %1, %cst {dimension_numbers = #tpu.dot_dimension_numbers<[1], [0], [0], [1], [0, 0, 1, 1], [], []>} : vector<128x256xbf16>, vector<256x128xbf16>, vector<128x128xf32> -> vector<128x128xf32>
    %c0_3 = arith.constant 0 : index
    %c0_4 = arith.constant 0 : index
    %3 = vector.load %arg2[%c0_3, %c0_4] : memref<1x128xf32, #tpu.memory_space<vmem>>, vector<1x128xf32>
    %4 = vector.broadcast %3 : vector<1x128xf32> to vector<128x128xf32>
    %5 = arith.addf %2, %4 : vector<128x128xf32>
    %cst_5 = arith.constant 0.000000e+00 : f32
    %6 = vector.broadcast %cst_5 : f32 to vector<128x128xf32>
    %7 = arith.maximumf %5, %6 : vector<128x128xf32>
    %8 = vector.shape_cast %7 : vector<128x128xf32> to vector<8x16x128xf32>
    %cst_6 = arith.constant dense<0.000000e+00> : vector<8x128xf32>
    %9 = vector.multi_reduction <add>, %8, %cst_6 [1] : vector<8x16x128xf32> to vector<8x128xf32>
    %cst_7 = arith.constant 1.600000e+01 : f32
    %10 = vector.broadcast %cst_7 : f32 to vector<8x128xf32>
    %11 = arith.divf %9, %10 : vector<8x128xf32>
    %c0_8 = arith.constant 0 : index
    %c0_9 = arith.constant 0 : index
    %c0_10 = arith.constant 0 : index
    %12 = vector.load %arg3[%c0_8, %c0_9, %c0_10] : memref<8x16x128xf32, #tpu.memory_space<vmem>>, vector<8x16x128xf32>
    %c0_11 = arith.constant 0 : index
    %c0_12 = arith.constant 0 : index
    %13 = vector.load %arg4[%c0_11, %c0_12] : memref<8x16xf32, #tpu.memory_space<vmem>>, vector<8x16xf32>
    %14 = vector.shape_cast %13 : vector<8x16xf32> to vector<8x16x1xf32>
    %15 = vector.broadcast %14 : vector<8x16x1xf32> to vector<8x16x128xf32>
    %16 = arith.mulf %12, %15 : vector<8x16x128xf32>
    %cst_13 = arith.constant dense<0.000000e+00> : vector<8x128xf32>
    %17 = vector.multi_reduction <add>, %16, %cst_13 [1] : vector<8x16x128xf32> to vector<8x128xf32>
    %18 = arith.truncf %17 : vector<8x128xf32> to vector<8x128xbf16>
    %c0_14 = arith.constant 0 : index
    %c0_15 = arith.constant 0 : index
    %19 = vector.load %arg5[%c0_14, %c0_15] : memref<128x128xbf16, #tpu.memory_space<vmem>>, vector<128x128xbf16>
    %cst_16 = arith.constant dense<0.000000e+00> : vector<8x128xf32>
    %20 = tpu.matmul %18, %19, %cst_16 {dimension_numbers = #tpu.dot_dimension_numbers<[1], [0], [0], [1], [0, 0, 1, 1], [], []>} : vector<8x128xbf16>, vector<128x128xbf16>, vector<8x128xf32> -> vector<8x128xf32>
    %c0_17 = arith.constant 0 : index
    %c0_18 = arith.constant 0 : index
    %21 = vector.load %arg6[%c0_17, %c0_18] : memref<1x128xf32, #tpu.memory_space<vmem>>, vector<1x128xf32>
    %22 = vector.broadcast %21 : vector<1x128xf32> to vector<8x128xf32>
    %23 = arith.addf %20, %22 : vector<8x128xf32>
    %cst_19 = arith.constant 5.000000e-01 : f32
    %24 = vector.broadcast %cst_19 : f32 to vector<8x128xf32>
    %25 = arith.mulf %24, %23 : vector<8x128xf32>
    %cst_20 = arith.constant 4.471500e-02 : f32
    %26 = vector.broadcast %cst_20 : f32 to vector<8x128xf32>
    %27 = arith.mulf %26, %23 : vector<8x128xf32>
    %28 = arith.mulf %27, %23 : vector<8x128xf32>
    %29 = arith.mulf %28, %23 : vector<8x128xf32>
    %30 = arith.addf %23, %29 : vector<8x128xf32>
    %cst_21 = arith.constant 0.797884583 : f32
    %31 = vector.broadcast %cst_21 : f32 to vector<8x128xf32>
    %32 = arith.mulf %31, %30 : vector<8x128xf32>
    %33 = math.tanh %32 : vector<8x128xf32>
    %cst_22 = arith.constant 1.000000e+00 : f32
    %34 = vector.broadcast %cst_22 : f32 to vector<8x128xf32>
    %35 = arith.addf %34, %33 : vector<8x128xf32>
    %36 = arith.mulf %25, %35 : vector<8x128xf32>
    %cst_23 = arith.constant 0.000000e+00 : f32
    %37 = vector.broadcast %cst_23 : f32 to vector<8x128xf32>
    %38 = tpu.concatenate %11, %37 in 1 : vector<8x128xf32>, vector<8x128xf32> -> vector<8x256xf32>
    %39 = tpu.concatenate %37, %36 in 1 : vector<8x128xf32>, vector<8x128xf32> -> vector<8x256xf32>
    %40 = tpu.concatenate %38, %39 in 0 : vector<8x256xf32>, vector<8x256xf32> -> vector<16x256xf32>
    %41 = arith.truncf %40 : vector<16x256xf32> to vector<16x256xbf16>
    %c0_24 = arith.constant 0 : index
    %c0_25 = arith.constant 0 : index
    %42 = vector.load %arg7[%c0_24, %c0_25] : memref<256x256xbf16, #tpu.memory_space<vmem>>, vector<256x256xbf16>
    %cst_26 = arith.constant dense<0.000000e+00> : vector<16x256xf32>
    %43 = tpu.matmul %41, %42, %cst_26 {dimension_numbers = #tpu.dot_dimension_numbers<[1], [0], [0], [1], [0, 0, 1, 1], [], []>} : vector<16x256xbf16>, vector<256x256xbf16>, vector<16x256xf32> -> vector<16x256xf32>
    %c0_27 = arith.constant 0 : index
    %c0_28 = arith.constant 0 : index
    %44 = vector.load %arg8[%c0_27, %c0_28] : memref<1x256xf32, #tpu.memory_space<vmem>>, vector<1x256xf32>
    %45 = vector.broadcast %44 : vector<1x256xf32> to vector<16x256xf32>
    %46 = arith.addf %43, %45 : vector<16x256xf32>
    %cst_29 = arith.constant 5.000000e-01 : f32
    %47 = vector.broadcast %cst_29 : f32 to vector<16x256xf32>
    %48 = arith.mulf %47, %46 : vector<16x256xf32>
    %cst_30 = arith.constant 4.471500e-02 : f32
    %49 = vector.broadcast %cst_30 : f32 to vector<16x256xf32>
    %50 = arith.mulf %49, %46 : vector<16x256xf32>
    %51 = arith.mulf %50, %46 : vector<16x256xf32>
    %52 = arith.mulf %51, %46 : vector<16x256xf32>
    %53 = arith.addf %46, %52 : vector<16x256xf32>
    %cst_31 = arith.constant 0.797884583 : f32
    %54 = vector.broadcast %cst_31 : f32 to vector<16x256xf32>
    %55 = arith.mulf %54, %53 : vector<16x256xf32>
    %56 = math.tanh %55 : vector<16x256xf32>
    %cst_32 = arith.constant 1.000000e+00 : f32
    %57 = vector.broadcast %cst_32 : f32 to vector<16x256xf32>
    %58 = arith.addf %57, %56 : vector<16x256xf32>
    %59 = arith.mulf %48, %58 : vector<16x256xf32>
    %60 = arith.truncf %59 : vector<16x256xf32> to vector<16x256xbf16>
    %c0_33 = arith.constant 0 : index
    %c0_34 = arith.constant 0 : index
    %61 = vector.load %arg9[%c0_33, %c0_34] : memref<256x256xbf16, #tpu.memory_space<vmem>>, vector<256x256xbf16>
    %cst_35 = arith.constant dense<0.000000e+00> : vector<16x256xf32>
    %62 = tpu.matmul %60, %61, %cst_35 {dimension_numbers = #tpu.dot_dimension_numbers<[1], [0], [0], [1], [0, 0, 1, 1], [], []>} : vector<16x256xbf16>, vector<256x256xbf16>, vector<16x256xf32> -> vector<16x256xf32>
    %c0_36 = arith.constant 0 : index
    %c0_37 = arith.constant 0 : index
    %63 = vector.load %arg10[%c0_36, %c0_37] : memref<1x256xf32, #tpu.memory_space<vmem>>, vector<1x256xf32>
    %64 = vector.broadcast %63 : vector<1x256xf32> to vector<16x256xf32>
    %65 = arith.addf %62, %64 : vector<16x256xf32>
    %66 = arith.addf %65, %46 : vector<16x256xf32>
    %67 = vector.extract_strided_slice %66 {offsets = [0, 0], sizes = [8, 128], strides = [1, 1]} : vector<16x256xf32> to vector<8x128xf32>
    %68 = vector.extract_strided_slice %66 {offsets = [8, 128], sizes = [8, 128], strides = [1, 1]} : vector<16x256xf32> to vector<8x128xf32>
    %c0_38 = arith.constant 0 : index
    %c0_39 = arith.constant 0 : index
    %69 = vector.load %arg11[%c0_38, %c0_39] : memref<1x128xf32, #tpu.memory_space<vmem>>, vector<1x128xf32>
    %c0_40 = arith.constant 0 : index
    %c0_41 = arith.constant 0 : index
    %70 = vector.load %arg12[%c0_40, %c0_41] : memref<1x128xf32, #tpu.memory_space<vmem>>, vector<1x128xf32>
    %cst_42 = arith.constant dense<0.000000e+00> : vector<8xf32>
    %71 = vector.multi_reduction <add>, %67, %cst_42 [1] : vector<8x128xf32> to vector<8xf32>
    %72 = vector.shape_cast %71 : vector<8xf32> to vector<8x1xf32>
    %cst_43 = arith.constant 1.280000e+02 : f32
    %73 = vector.broadcast %cst_43 : f32 to vector<8x1xf32>
    %74 = arith.divf %72, %73 : vector<8x1xf32>
    %75 = vector.broadcast %74 : vector<8x1xf32> to vector<8x128xf32>
    %76 = arith.subf %67, %75 : vector<8x128xf32>
    %77 = vector.broadcast %74 : vector<8x1xf32> to vector<8x128xf32>
    %78 = arith.subf %67, %77 : vector<8x128xf32>
    %79 = arith.mulf %76, %78 : vector<8x128xf32>
    %cst_44 = arith.constant dense<0.000000e+00> : vector<8xf32>
    %80 = vector.multi_reduction <add>, %79, %cst_44 [1] : vector<8x128xf32> to vector<8xf32>
    %81 = vector.shape_cast %80 : vector<8xf32> to vector<8x1xf32>
    %cst_45 = arith.constant 1.280000e+02 : f32
    %82 = vector.broadcast %cst_45 : f32 to vector<8x1xf32>
    %83 = arith.divf %81, %82 : vector<8x1xf32>
    %84 = vector.broadcast %74 : vector<8x1xf32> to vector<8x128xf32>
    %85 = arith.subf %67, %84 : vector<8x128xf32>
    %cst_46 = arith.constant 9.99999974E-6 : f32
    %86 = vector.broadcast %cst_46 : f32 to vector<8x1xf32>
    %87 = arith.addf %83, %86 : vector<8x1xf32>
    %88 = math.rsqrt %87 : vector<8x1xf32>
    %89 = vector.broadcast %88 : vector<8x1xf32> to vector<8x128xf32>
    %90 = arith.mulf %85, %89 : vector<8x128xf32>
    %91 = vector.broadcast %69 : vector<1x128xf32> to vector<8x128xf32>
    %92 = arith.mulf %90, %91 : vector<8x128xf32>
    %93 = vector.broadcast %70 : vector<1x128xf32> to vector<8x128xf32>
    %94 = arith.addf %92, %93 : vector<8x128xf32>
    %c0_47 = arith.constant 0 : index
    %c0_48 = arith.constant 0 : index
    %95 = vector.load %arg13[%c0_47, %c0_48] : memref<1x128xf32, #tpu.memory_space<vmem>>, vector<1x128xf32>
    %c0_49 = arith.constant 0 : index
    %c0_50 = arith.constant 0 : index
    %96 = vector.load %arg14[%c0_49, %c0_50] : memref<1x128xf32, #tpu.memory_space<vmem>>, vector<1x128xf32>
    %cst_51 = arith.constant dense<0.000000e+00> : vector<8xf32>
    %97 = vector.multi_reduction <add>, %68, %cst_51 [1] : vector<8x128xf32> to vector<8xf32>
    %98 = vector.shape_cast %97 : vector<8xf32> to vector<8x1xf32>
    %cst_52 = arith.constant 1.280000e+02 : f32
    %99 = vector.broadcast %cst_52 : f32 to vector<8x1xf32>
    %100 = arith.divf %98, %99 : vector<8x1xf32>
    %101 = vector.broadcast %100 : vector<8x1xf32> to vector<8x128xf32>
    %102 = arith.subf %68, %101 : vector<8x128xf32>
    %103 = vector.broadcast %100 : vector<8x1xf32> to vector<8x128xf32>
    %104 = arith.subf %68, %103 : vector<8x128xf32>
    %105 = arith.mulf %102, %104 : vector<8x128xf32>
    %cst_53 = arith.constant dense<0.000000e+00> : vector<8xf32>
    %106 = vector.multi_reduction <add>, %105, %cst_53 [1] : vector<8x128xf32> to vector<8xf32>
    %107 = vector.shape_cast %106 : vector<8xf32> to vector<8x1xf32>
    %cst_54 = arith.constant 1.280000e+02 : f32
    %108 = vector.broadcast %cst_54 : f32 to vector<8x1xf32>
    %109 = arith.divf %107, %108 : vector<8x1xf32>
    %110 = vector.broadcast %100 : vector<8x1xf32> to vector<8x128xf32>
    %111 = arith.subf %68, %110 : vector<8x128xf32>
    %cst_55 = arith.constant 9.99999974E-6 : f32
    %112 = vector.broadcast %cst_55 : f32 to vector<8x1xf32>
    %113 = arith.addf %109, %112 : vector<8x1xf32>
    %114 = math.rsqrt %113 : vector<8x1xf32>
    %115 = vector.broadcast %114 : vector<8x1xf32> to vector<8x128xf32>
    %116 = arith.mulf %111, %115 : vector<8x128xf32>
    %117 = vector.broadcast %95 : vector<1x128xf32> to vector<8x128xf32>
    %118 = arith.mulf %116, %117 : vector<8x128xf32>
    %119 = vector.broadcast %96 : vector<1x128xf32> to vector<8x128xf32>
    %120 = arith.addf %118, %119 : vector<8x128xf32>
    %121 = arith.mulf %94, %94 : vector<8x128xf32>
    %cst_56 = arith.constant dense<0.000000e+00> : vector<8xf32>
    %122 = vector.multi_reduction <add>, %121, %cst_56 [1] : vector<8x128xf32> to vector<8xf32>
    %123 = vector.shape_cast %122 : vector<8xf32> to vector<8x1xf32>
    %cst_57 = arith.constant 9.99999996E-13 : f32
    %124 = vector.broadcast %cst_57 : f32 to vector<8x1xf32>
    %125 = arith.addf %123, %124 : vector<8x1xf32>
    %126 = math.rsqrt %125 : vector<8x1xf32>
    %127 = vector.broadcast %126 : vector<8x1xf32> to vector<8x128xf32>
    %128 = arith.mulf %94, %127 : vector<8x128xf32>
    %129 = arith.mulf %120, %120 : vector<8x128xf32>
    %cst_58 = arith.constant dense<0.000000e+00> : vector<8xf32>
    %130 = vector.multi_reduction <add>, %129, %cst_58 [1] : vector<8x128xf32> to vector<8xf32>
    %131 = vector.shape_cast %130 : vector<8xf32> to vector<8x1xf32>
    %cst_59 = arith.constant 9.99999996E-13 : f32
    %132 = vector.broadcast %cst_59 : f32 to vector<8x1xf32>
    %133 = arith.addf %131, %132 : vector<8x1xf32>
    %134 = math.rsqrt %133 : vector<8x1xf32>
    %135 = vector.broadcast %134 : vector<8x1xf32> to vector<8x128xf32>
    %136 = arith.mulf %120, %135 : vector<8x128xf32>
    %137 = arith.truncf %136 : vector<8x128xf32> to vector<8x128xbf16>
    %cst_60 = arith.constant 1.000000e+00 : f32
    %138 = vector.broadcast %cst_60 : f32 to vector<8x128xf32>
    %139 = arith.mulf %128, %138 : vector<8x128xf32>
    %140 = arith.truncf %139 : vector<8x128xf32> to vector<8x128xbf16>
    %cst_61 = arith.constant dense<0.000000e+00> : vector<8x8xf32>
    %141 = tpu.matmul %137, %140, %cst_61 {dimension_numbers = #tpu.dot_dimension_numbers<[1], [1], [0], [0], [0, 0, 1, 0], [], []>} : vector<8x128xbf16>, vector<8x128xbf16>, vector<8x8xf32> -> vector<8x8xf32>
    %142 = tpu.concatenate %136, %128 in 1 : vector<8x128xf32>, vector<8x128xf32> -> vector<8x256xf32>
    %143 = arith.truncf %142 : vector<8x256xf32> to vector<8x256xbf16>
    %144 = tpu.concatenate %128, %136 in 1 : vector<8x128xf32>, vector<8x128xf32> -> vector<8x256xf32>
    %145 = arith.truncf %144 : vector<8x256xf32> to vector<8x256xbf16>
    %cst_62 = arith.constant dense<0.000000e+00> : vector<8x8xf32>
    %146 = tpu.matmul %143, %145, %cst_62 {dimension_numbers = #tpu.dot_dimension_numbers<[1], [1], [0], [0], [0, 0, 1, 0], [], []>} : vector<8x256xbf16>, vector<8x256xbf16>, vector<8x8xf32> -> vector<8x8xf32>
    %cst_63 = arith.constant 5.000000e-01 : f32
    %147 = vector.broadcast %cst_63 : f32 to vector<8x8xf32>
    %148 = arith.mulf %147, %146 : vector<8x8xf32>
    %cst_64 = arith.constant dense<0xFF800000> : vector<8xf32>
    %149 = vector.multi_reduction <maximumf>, %148, %cst_64 [1] : vector<8x8xf32> to vector<8xf32>
    %150 = vector.shape_cast %149 : vector<8xf32> to vector<8x1xf32>
    %151 = vector.broadcast %150 : vector<8x1xf32> to vector<8x8xf32>
    %152 = arith.subf %148, %151 : vector<8x8xf32>
    %153 = math.exp %152 : vector<8x8xf32>
    %cst_65 = arith.constant dense<0.000000e+00> : vector<8xf32>
    %154 = vector.multi_reduction <add>, %153, %cst_65 [1] : vector<8x8xf32> to vector<8xf32>
    %155 = vector.shape_cast %154 : vector<8xf32> to vector<8x1xf32>
    %156 = tpu.reciprocal %155 : vector<8x1xf32> -> vector<8x1xf32>
    %157 = vector.broadcast %156 : vector<8x1xf32> to vector<8x8xf32>
    %158 = arith.mulf %153, %157 : vector<8x8xf32>
    %cst_66 = arith.constant dense<0xFF800000> : vector<8xf32>
    %159 = vector.multi_reduction <maximumf>, %141, %cst_66 [1] : vector<8x8xf32> to vector<8xf32>
    %160 = vector.shape_cast %159 : vector<8xf32> to vector<8x1xf32>
    %161 = vector.broadcast %160 : vector<8x1xf32> to vector<8x8xf32>
    %162 = arith.subf %141, %161 : vector<8x8xf32>
    %163 = math.exp %162 : vector<8x8xf32>
    %cst_67 = arith.constant dense<0.000000e+00> : vector<8xf32>
    %164 = vector.multi_reduction <add>, %163, %cst_67 [1] : vector<8x8xf32> to vector<8xf32>
    %165 = vector.shape_cast %164 : vector<8xf32> to vector<8x1xf32>
    %166 = math.log %165 : vector<8x1xf32>
    %167 = vector.broadcast %166 : vector<8x1xf32> to vector<8x8xf32>
    %168 = arith.subf %162, %167 : vector<8x8xf32>
    %169 = arith.mulf %158, %168 : vector<8x8xf32>
    %cst_68 = arith.constant dense<0.000000e+00> : vector<8xf32>
    %170 = vector.multi_reduction <add>, %169, %cst_68 [1] : vector<8x8xf32> to vector<8xf32>
    %171 = vector.shape_cast %170 : vector<8xf32> to vector<8x1xf32>
    %cst_69 = arith.constant 0.000000e+00 : f32
    %172 = vector.broadcast %cst_69 : f32 to vector<8x1xf32>
    %173 = arith.subf %172, %171 : vector<8x1xf32>
    %cst_70 = arith.constant dense<0xFF800000> : vector<8xf32>
    %174 = vector.multi_reduction <maximumf>, %141, %cst_70 [0] : vector<8x8xf32> to vector<8xf32>
    %175 = vector.shape_cast %174 : vector<8xf32> to vector<1x8xf32>
    %176 = vector.broadcast %175 : vector<1x8xf32> to vector<8x8xf32>
    %177 = arith.subf %141, %176 : vector<8x8xf32>
    %178 = math.exp %177 : vector<8x8xf32>
    %cst_71 = arith.constant dense<0.000000e+00> : vector<8xf32>
    %179 = vector.multi_reduction <add>, %178, %cst_71 [0] : vector<8x8xf32> to vector<8xf32>
    %180 = vector.shape_cast %179 : vector<8xf32> to vector<1x8xf32>
    %181 = math.log %180 : vector<1x8xf32>
    %182 = vector.broadcast %181 : vector<1x8xf32> to vector<8x8xf32>
    %183 = arith.subf %177, %182 : vector<8x8xf32>
    %184 = arith.mulf %158, %183 : vector<8x8xf32>
    %cst_72 = arith.constant dense<0.000000e+00> : vector<8xf32>
    %185 = vector.multi_reduction <add>, %184, %cst_72 [0] : vector<8x8xf32> to vector<8xf32>
    %186 = vector.shape_cast %185 : vector<8xf32> to vector<1x8xf32>
    %cst_73 = arith.constant 0.000000e+00 : f32
    %187 = vector.broadcast %cst_73 : f32 to vector<1x8xf32>
    %188 = arith.subf %187, %186 : vector<1x8xf32>
    %189 = vector.shape_cast %173 : vector<8x1xf32> to vector<1x8x1xf32>
    %cst_74 = arith.constant dense<0.000000e+00> : vector<1xf32>
    %190 = vector.multi_reduction <add>, %189, %cst_74 [1, 2] : vector<1x8x1xf32> to vector<1xf32>
    %191 = vector.shape_cast %190 : vector<1xf32> to vector<1x1x1xf32>
    %192 = vector.extract %191[0, 0, 0] : f32 from vector<1x1x1xf32>
    %cst_75 = arith.constant 8.000000e+00 : f32
    %193 = arith.divf %192, %cst_75 : f32
    %194 = vector.shape_cast %188 : vector<1x8xf32> to vector<1x1x8xf32>
    %cst_76 = arith.constant dense<0.000000e+00> : vector<1xf32>
    %195 = vector.multi_reduction <add>, %194, %cst_76 [1, 2] : vector<1x1x8xf32> to vector<1xf32>
    %196 = vector.shape_cast %195 : vector<1xf32> to vector<1x1x1xf32>
    %197 = vector.extract %196[0, 0, 0] : f32 from vector<1x1x1xf32>
    %cst_77 = arith.constant 8.000000e+00 : f32
    %198 = arith.divf %197, %cst_77 : f32
    %199 = arith.addf %193, %198 : f32
    %cst_78 = arith.constant 5.000000e-01 : f32
    %200 = arith.mulf %cst_78, %199 : f32
    %c0_79 = arith.constant 0 : index
    %c0_80 = arith.constant 0 : index
    %201 = memref.load %arg15[%c0_79, %c0_80] : memref<1x1xf32, #tpu.memory_space<smem>>
    memref.store %200, %arg15[%c0_79, %c0_80] : memref<1x1xf32, #tpu.memory_space<smem>>
    return
  }
}

</mosaic_0001>

<bundles_post_ra>
// kernel: tpu_custom_call.1
= control target key start
LH: loop header
LB: loop body
LE: loop exit
PB: predicated region body
PF: predicated region fallthrough
CT: control target
= control target key end

     0   :  { %20 = vsyncpa [#allocation3], 0  ;;  %s2498_s0 = inlined_call_operand.hbm [shape: bf16[128,256], index: 0, kind: input, shape index: {}]   ;;  %s2499_s1 = inlined_call_operand.hbm [shape: bf16[256,128], index: 1, kind: input, shape index: {}]   ;;  %s2500_s2 = inlined_call_operand.vmem [shape: f32[1,128], index: 2, kind: input, shape index: {}]   ;;  %s2501_s3 = inlined_call_operand.hbm [shape: f32[8,16,128], index: 3, kind: input, shape index: {}]   ;;  %s2502_s4 = inlined_call_operand.hbm [shape: f32[8,16], index: 4, kind: input, shape index: {}]   ;;  %s2503_s5 = inlined_call_operand.hbm [shape: bf16[128,128], index: 5, kind: input, shape index: {}]   ;;  %s2504_s6 = inlined_call_operand.vmem [shape: f32[1,128], index: 6, kind: input, shape index: {}]   ;;  %s2505_s7 = inlined_call_operand.hbm [shape: bf16[256,256], index: 7, kind: input, shape index: {}]   ;;  %s2506_s8 = inlined_call_operand.vmem [shape: f32[1,256], index: 8, kind: input, shape index: {}]   ;;  %s2507_s9 = inlined_call_operand.hbm [shape: bf16[256,256], index: 9, kind: input, shape index: {}]   ;;  %s2508_s10 = inlined_call_operand.vmem [shape: f32[1,256], index: 10, kind: input, shape index: {}]   ;;  %s2509_s11 = inlined_call_operand.vmem [shape: f32[1,128], index: 11, kind: input, shape index: {}]   ;;  %s2510_s12 = inlined_call_operand.vmem [shape: f32[1,128], index: 12, kind: input, shape index: {}]   ;;  %s2511_s13 = inlined_call_operand.vmem [shape: f32[1,128], index: 13, kind: input, shape index: {}]   ;;  %s2512_s14 = inlined_call_operand.vmem [shape: f32[1,128], index: 14, kind: input, shape index: {}]   ;;  %s2513_s15 = inlined_call_operand.hbm [shape: f32[1,1], index: 15, kind: output, shape index: {}]  }
   0x1   :  { %21 = vsyncpa [#allocation6], 0 }
   0x2   :  { %22 = vsyncpa [#allocation9], 0 }
   0x3   :  { %23 = vsyncpa [#allocation12], 0 }
   0x4   :  { %24 = vsyncpa [#allocation4], 0  ;;  %s2258_s18 = smov [#allocation5]  }
   0x5   :  { %s42_s19 = sshll.u32 %s2258_s18, 4  ;;  %s43_s19 = int_to_ptr.vmem [resolvable:$true] %s42_s19 }
   0x6   :  { %s2108_s20 = scalar_lea.vmem %s43_s19, 2048  ;;  %p2113_p1 = scmp.lt.s32.totalorder %s43_s19, %s43_s19 }
   0x7   :  { %p2109_p0 = scmp.ne.s32.totalorder %s43_s19, %s2108_s20  ;;  %p2114_p2 = scmp.lt.s32.totalorder %s2108_s20, %s2108_s20 }
   0x9   :  { %p2115_p3 = por %p2114_p2, %p2113_p1 }
   0xb   :  { %p2116_p4 = pnand %p2115_p3, %p2109_p0 }
   0xd   :  { %2119 = shalt.err (!%p2116_p4)
}
   0xe   :  { %s2259_s21 = smov 64   ;;  %s2260_s22 = smov 4  }
   0xf   :  { %48 = dma.hbm_to_vmem [thread:$0]  %s2499_s1, 2048, %s43_s19, [#allocation6], %s2259_s21, %s2259_s21, %s2260_s22  }
  0x10   :  { %s2261_s25 = smov [#allocation8]  }
  0x11   :  { %s69_s26 = sshll.u32 %s2261_s25, 4  ;;  %s70_s26 = int_to_ptr.vmem [resolvable:$true] %s69_s26 }
  0x12   :  { %s2128_s27 = scalar_lea.vmem %s70_s26, 128  ;;  %p2133_p6 = scmp.lt.s32.totalorder %s70_s26, %s70_s26 }
  0x13   :  { %p2129_p5 = scmp.ne.s32.totalorder %s70_s26, %s2128_s27  ;;  %p2134_p7 = scmp.lt.s32.totalorder %s2128_s27, %s2128_s27 }
  0x15   :  { %p2135_p8 = por %p2134_p7, %p2133_p6 }
  0x17   :  { %p2136_p9 = pnand %p2135_p8, %p2129_p5 }
  0x19   :  { %2139 = shalt.err (!%p2136_p9)
}
  0x1a   :  { %72 = dma.hbm_to_vmem [thread:$0]  %s2502_s4, 128, %s70_s26, [#allocation9]  }
  0x1b   :  { %s2262_s30 = smov [#allocation11]   ;;  %s2263_s17 = smov [#allocation2]  }
  0x1c   :  { %s92_s16 = sshll.u32 %s2262_s30, 4  ;;  %s30_s18 = sshll.u32 %s2263_s17, 4  ;;  %s93_s16 = int_to_ptr.vmem [resolvable:$true] %s92_s16  ;;  %s31_s18 = int_to_ptr.vmem [resolvable:$true] %s30_s18 }
  0x1d   :  { %s2148_s1 = scalar_lea.vmem %s93_s16, 4096  ;;  %p2153_p11 = scmp.lt.s32.totalorder %s93_s16, %s93_s16 }
  0x1e   :  { %p2149_p10 = scmp.ne.s32.totalorder %s93_s16, %s2148_s1  ;;  %p2154_p12 = scmp.lt.s32.totalorder %s2148_s1, %s2148_s1 }
  0x20   :  { %p2155_p13 = por %p2154_p12, %p2153_p11 }
  0x22   :  { %p2156_p0 = pnand %p2155_p13, %p2149_p10 }
  0x24   :  { %2159 = shalt.err (!%p2156_p0)
}
  0x25   :  { %s2264_s19 = smov 128   ;;  %s2265_s20 = smov 8  }
  0x26   :  { %98 = dma.hbm_to_vmem [thread:$0]  %s2505_s7, 4096, %s93_s16, [#allocation12], %s2264_s19, %s2264_s19, %s2265_s20  }
  0x27   :  { %s2168_s24 = scalar_lea.vmem %s31_s18, 2048  ;;  %p2173_p2 = scmp.lt.s32.totalorder %s31_s18, %s31_s18 }
  0x28   :  { %p2169_p1 = scmp.ne.s32.totalorder %s31_s18, %s2168_s24  ;;  %p2174_p3 = scmp.lt.s32.totalorder %s2168_s24, %s2168_s24 }
  0x2a   :  { %p2175_p4 = por %p2174_p3, %p2173_p2 }
  0x2c   :  { %p2176_p5 = pnand %p2175_p4, %p2169_p1 }
  0x2e   :  { %2179 = shalt.err (!%p2176_p5)
}
  0x2f   :  { %36 = dma.hbm_to_vmem [thread:$0]  %s2498_s0, 2048, %s31_s18, [#allocation3], %s2264_s19, %s2264_s19, %s2265_s20  }
  0x30   :  { %s2266_s27 = smov [#allocation7]   ;;  %s2267_s29 = smov [#allocation10]  }
  0x31   :  { %s56_s28 = sshll.u32 %s2266_s27, 4  ;;  %s78_s30 = sshll.u32 %s2267_s29, 4  ;;  %s57_s28 = int_to_ptr.vmem [resolvable:$true] %s56_s28  ;;  %s79_s30 = int_to_ptr.vmem [resolvable:$true] %s78_s30 }
  0x32   :  { %s2188_s7 = scalar_lea.vmem %s57_s28, 2048  ;;  %p2193_p7 = scmp.lt.s32.totalorder %s57_s28, %s57_s28 }
  0x33   :  { %p2189_p6 = scmp.ne.s32.totalorder %s57_s28, %s2188_s7  ;;  %p2194_p8 = scmp.lt.s32.totalorder %s2188_s7, %s2188_s7 }
  0x35   :  { %p2195_p9 = por %p2194_p8, %p2193_p7 }
  0x37   :  { %p2196_p10 = pnand %p2195_p9, %p2189_p6 }
  0x39   :  { %2199 = shalt.err (!%p2196_p10)
}
  0x3a   :  { %62 = dma.hbm_to_vmem [thread:$0]  %s2501_s3, 2048, %s57_s28, [#allocation6], %s2264_s19, %s2264_s19, %s2265_s20  }
  0x3b   :  { %s2208_s0 = scalar_lea.vmem %s79_s30, 1024  ;;  %p2213_p12 = scmp.lt.s32.totalorder %s79_s30, %s79_s30 }
  0x3c   :  { %p2209_p11 = scmp.ne.s32.totalorder %s79_s30, %s2208_s0  ;;  %p2214_p13 = scmp.lt.s32.totalorder %s2208_s0, %s2208_s0 }
  0x3e   :  { %p2215_p0 = por %p2214_p13, %p2213_p12 }
  0x40   :  { %p2216_p1 = pnand %p2215_p0, %p2209_p11 }
  0x42   :  { %2219 = shalt.err (!%p2216_p1)
}
  0x43   :  { %84 = dma.hbm_to_vmem [thread:$0]  %s2503_s5, 1024, %s79_s30, [#allocation9], %s2259_s21, %s2259_s21, %s2260_s22  }
  0x44   :  { %s2268_s23 = smov [#allocation13]  }
  0x45   :  { %s106_s4 = sshll.u32 %s2268_s23, 4  ;;  %s107_s4 = int_to_ptr.vmem [resolvable:$true] %s106_s4 }
  0x46   :  { %s2228_s24 = scalar_lea.vmem %s107_s4, 4096  ;;  %p2233_p3 = scmp.lt.s32.totalorder %s107_s4, %s107_s4 }
  0x47   :  { %p2229_p2 = scmp.ne.s32.totalorder %s107_s4, %s2228_s24  ;;  %p2234_p4 = scmp.lt.s32.totalorder %s2228_s24, %s2228_s24 }
  0x49   :  { %p2235_p5 = por %p2234_p4, %p2233_p3 }
  0x4b   :  { %p2236_p6 = pnand %p2235_p5, %p2229_p2 }
  0x4d   :  { %2239 = shalt.err (!%p2236_p6)
}
  0x4e   :  { %112 = dma.hbm_to_vmem [thread:$0]  %s2507_s9, 4096, %s107_s4, [#allocation12], %s2264_s19, %s2264_s19, %s2265_s20  }
  0x4f   :  { %2248 = dma.done.wait [#allocation3], 2048  }
  0x50   :  { %2249 = vsyncadd [#allocation3], 4294965248 }
  0x51   :  { %2250 = dma.done.wait [#allocation6], 4096  }
  0x52   :  { %2251 = vsyncadd [#allocation6], 4294963200 }
  0x53   :  { %2252 = dma.done.wait [#allocation9], 1152  }
  0x54   :  { %2253 = vsyncadd [#allocation9], 4294966144 }
  0x55   :  { %2254 = dma.done.wait [#allocation12], 8192  }
  0x56   :  { %2255 = vsyncadd [#allocation12], 4294959104  ;;  %v571_v0 = vlaneseq  ;;  %v570_v4 = vld [vmem:[#allocation8] sm:$0xff]  ;;  %v1926_v7 = vld [vmem:[#allocation5 + $0x78] sm:$0xff]   ;;  %v2269_v17 = vmov 0.0   ;;  %vm2270_vm0 = vmmov 0  }
  0x57   :  { %v1927_v8 = vld [vmem:[#allocation5 + $0x38] sm:$0xff]   ;;  %v1928_v10 = vld [vmem:[#allocation5 + $0x70] sm:$0xff]   ;;  %1807 = vmatprep.subr.bf16.mxu0 %v1926_v7  ;;  %v1930_v12 = vld [vmem:[#allocation5 + $0x68] sm:$0xff]   ;;  %1882 = vmatprep.subr.bf16.mxu1 %v2269_v17  ;;  %vm778_vm1 = vcmask 1041409   ;;  %vm780_vm2 = vcmask 1042434   ;;  %vm782_vm3 = vcmask 1043459  }
  0x58   :  { %v2391_v1 = vshrl.u32 %v571_v0, 7  ;;  %1808 = vmatpush3.bf16.msra.mxu0 %v1927_v8  ;;  %v1929_v11 = vld [vmem:[#allocation5 + $0x30] sm:$0xff]   ;;  %v1931_v15 = vld [vmem:[#allocation5 + $0x28] sm:$0xff]   ;;  %v1932_v16 = vld [vmem:[#allocation5 + $0x60] sm:$0xff]   ;;  %1898 = vmatprep.mubr.msk.bf16.mxu1 %vm2270_vm0, %v2269_v17  ;;  %vm784_vm4 = vcmask 1044484   ;;  %vm786_vm5 = vcmask 1045509  }
  0x59   :  { %1809 = vmatprep.subr.bf16.mxu0 %v1928_v10  ;;  %v1933_v20 = vld [vmem:[#allocation5 + $0x20] sm:$0xff]   ;;  %v1934_v21 = vld [vmem:[#allocation5 + $0x58] sm:$0xff]   ;;  %v1936_v26 = vld [vmem:[#allocation5 + $0x50] sm:$0xff]   ;;  %vm788_vm6 = vcmask 1046534   ;;  %vm790_vm7 = vcmask 1047559   ;;  %vm1591_vm8 = vcmask 64512  }
  0x5a   :  { %v2394_v2 = vsub.s32 1, %v2391_v1  ;;  %v2397_v3 = vsub.s32 0, %v2391_v1  ;;  %v595_v9 = vsub.s32 2, %v2391_v1  ;;  %v606_v14 = vsub.s32 3, %v2391_v1  ;;  %v1935_v24 = vld [vmem:[#allocation5 + $0x18] sm:$0xff]   ;;  %v1937_v29 = vld [vmem:[#allocation5 + $0x10] sm:$0xff]  }
  0x5b   :  { %v617_v19 = vsub.s32 4, %v2391_v1  ;;  %v628_v23 = vsub.s32 5, %v2391_v1  ;;  %v1944_v25 = vld [vmem:[#allocation2 + $0x4] ss:$8 sps:$4 sm:$0xff]   ;;  %v639_v28 = vsub.s32 6, %v2391_v1  ;;  %v650_v32 = vsub.s32 7, %v2391_v1 }
  0x5c   :  { %v585_v5 = vrot.slane %v570_v4, %v2394_v2  ;;  %v574_v6 = vrot.slane %v570_v4, %v2397_v3  ;;  %v596_v13 = vrot.slane %v570_v4, %v595_v9  ;;  %1810 = vmatpush3.bf16.msra.mxu0 %v1929_v11  ;;  %v607_v18 = vrot.slane %v570_v4, %v606_v14  ;;  %v1938_v30 = vld [vmem:[#allocation5 + $0x48] sm:$0xff]   ;;  %v1940_v34 = vld [vmem:[#allocation5 + $0x40] sm:$0xff]   ;;  %v1945_v39 = vld [vmem:[#allocation2 + $0x14] ss:$8 sps:$4 sm:$0xff]   ;;  %s2271_s0 = smov [#allocation14]  }
  0x5d   :  { %1811 = vmatprep.subr.bf16.mxu0 %v1930_v12  ;;  %v618_v22 = vrot.slane %v570_v4, %v617_v19  ;;  %v629_v27 = vrot.slane %v570_v4, %v628_v23  ;;  %408 = vmatprep.mubr.bf16.mxu0 %v1944_v25  ;;  %v640_v31 = vrot.slane %v570_v4, %v639_v28  ;;  %v1939_v33 = vld [vmem:[#allocation5 + $0x8] sm:$0xff]   ;;  %v1941_v36 = vld [vmem:[#allocation5] sm:$0xff]   ;;  %v1967_v40 = vld [vmem:[#allocation10 + $0x30] sm:$0xff]   ;;  %vm1662_vm9 = vcmask 57344  }
  0x5e   :  { %587 = vbcast.lane.b32.xlu1 %v585_v5, 256  ;;  %576 = vbcast.lane.b32.xlu0 %v574_v6, 256  ;;  %v651_v35 = vrot.slane %v570_v4, %v650_v32  ;;  %v1942_v37 = vld [vmem:[#allocation2] ss:$8 sps:$4 sm:$0xff]   ;;  %v1947_v41 = vld [vmem:[#allocation2 + $0x10] ss:$8 sps:$4 sm:$0xff]  }
  0x5f   :  { %v1966_v38 = vld [vmem:[#allocation10 + $0x38] sm:$0xff]   ;;  %v1968_v42 = vld [vmem:[#allocation10 + $0x28] sm:$0xff]   ;;  %v1969_v44 = vld [vmem:[#allocation10 + $0x20] sm:$0xff]   ;;  %vm1648_vm10 = vcmask 7168  }
  0x60   :  { %1812 = vmatpush3.bf16.msra.mxu0 %v1931_v15  ;;  %1883 = vmatpush3.bf16.msra.mxu1 %v1966_v38  ;;  %v1948_v43 = vld [vmem:[#allocation2 + $0x24] ss:$8 sps:$4 sm:$0xff]   ;;  %v1950_v46 = vld [vmem:[#allocation2 + $0x20] ss:$8 sps:$4 sm:$0xff]   ;;  %v1951_v47 = vld [vmem:[#allocation2 + $0x34] ss:$8 sps:$4 sm:$0xff]  }
  0x61   :  { %1813 = vmatprep.subr.bf16.mxu0 %v1932_v16  ;;  %1884 = vmatprep.subr.bf16.mxu1 %v2269_v17  ;;  %v1970_v45 = vld [vmem:[#allocation10 + $0x18] sm:$0xff]   ;;  %v1971_v48 = vld [vmem:[#allocation10 + $0x10] sm:$0xff]   ;;  %v1972_v49 = vld [vmem:[#allocation10 + $0x8] sm:$0xff]  }
  0x62   :  { %591 = vbcast.lane.b32.xlu1 %v585_v5, 264  ;;  %580 = vbcast.lane.b32.xlu0 %v574_v6, 264  ;;  %v1953_v50 = vld [vmem:[#allocation2 + $0x30] ss:$8 sps:$4 sm:$0xff]   ;;  %v1954_v51 = vld [vmem:[#allocation2 + $0x44] ss:$8 sps:$4 sm:$0xff]  }
  0x63   :  { %v1973_v52 = vld [vmem:[#allocation10] sm:$0xff]   ;;  %v1957_v54 = vld [vmem:[#allocation2 + $0x54] ss:$8 sps:$4 sm:$0xff]   ;;  %v1959_v55 = vld [vmem:[#allocation2 + $0x50] ss:$8 sps:$4 sm:$0xff]  }
  0x64   :  { %1814 = vmatpush3.bf16.msra.mxu0 %v1933_v20  ;;  %1885 = vmatpush3.bf16.msra.mxu1 %v1967_v40  ;;  %v1956_v53 = vld [vmem:[#allocation2 + $0x40] ss:$8 sps:$4 sm:$0xff]   ;;  %v1960_v56 = vld [vmem:[#allocation2 + $0x64] ss:$8 sps:$4 sm:$0xff]   ;;  %v1963_v58 = vld [vmem:[#allocation2 + $0x74] ss:$8 sps:$4 sm:$0xff]  }
  0x65   :  { %1815 = vmatprep.subr.bf16.mxu0 %v1934_v21  ;;  %1886 = vmatprep.subr.bf16.mxu1 %v2269_v17  ;;  %v1962_v57 = vld [vmem:[#allocation2 + $0x60] ss:$8 sps:$4 sm:$0xff]   ;;  %v1965_v59 = vld [vmem:[#allocation2 + $0x70] ss:$8 sps:$4 sm:$0xff]  }
  0x66   :  { %602 = vbcast.lane.b32.xlu1 %v596_v13, 264  ;;  %598 = vbcast.lane.b32.xlu0 %v596_v13, 256  ;;  %v556_v62 = vld [vmem:[#allocation7 + $0x10] sm:$0xff]  ;;  %v554_v63 = vld [vmem:[#allocation7] sm:$0xff]  ;;  %v557_v0 = vld [vmem:[#allocation7 + $0x18] sm:$0xff] }
  0x67   :  { %v555_v1 = vld [vmem:[#allocation7 + $0x8] sm:$0xff]  ;;  %v558_v11 = vld [vmem:[#allocation7 + $0x20] sm:$0xff]  ;;  %v561_v20 = vld [vmem:[#allocation7 + $0x38] sm:$0xff] }
  0x68   :  { %1816 = vmatpush3.bf16.msra.mxu0 %v1935_v24  ;;  %1887 = vmatpush3.bf16.msra.mxu1 %v1968_v42  ;;  %v559_v10 = vld [vmem:[#allocation7 + $0x28] sm:$0xff]  ;;  %v560_v23 = vld [vmem:[#allocation7 + $0x30] sm:$0xff]  ;;  %v562_v32 = vld [vmem:[#allocation7 + $0x40] sm:$0xff] }
  0x69   :  { %1817 = vmatprep.subr.bf16.mxu0 %v1936_v26  ;;  %1888 = vmatprep.subr.bf16.mxu1 %v2269_v17 }
  0x6a   :  { %613 = vbcast.lane.b32.xlu1 %v607_v18, 264  ;;  %609 = vbcast.lane.b32.xlu0 %v607_v18, 256 }
  0x6c   :  { %1818 = vmatpush3.bf16.msra.mxu0 %v1937_v29  ;;  %1889 = vmatpush3.bf16.msra.mxu1 %v1969_v44 }
  0x6d   :  { %1819 = vmatprep.subr.bf16.mxu0 %v1938_v30  ;;  %1890 = vmatprep.subr.bf16.mxu1 %v2269_v17  ;;  %v563_v30 = vld [vmem:[#allocation7 + $0x48] sm:$0xff] }
  0x6e   :  { %624 = vbcast.lane.b32.xlu1 %v618_v22, 264  ;;  %620 = vbcast.lane.b32.xlu0 %v618_v22, 256 }
  0x70   :  { %1820 = vmatpush3.bf16.msra.mxu0 %v1939_v33  ;;  %1891 = vmatpush3.bf16.msra.mxu1 %v1970_v45 }
  0x71   :  { %1821 = vmatprep.subr.bf16.mxu0 %v1940_v34  ;;  %1892 = vmatprep.subr.bf16.mxu1 %v2269_v17 }
  0x72   :  { %635 = vbcast.lane.b32.xlu1 %v629_v27, 264  ;;  %631 = vbcast.lane.b32.xlu0 %v629_v27, 256 }
  0x74   :  { %1822 = vmatpush3.bf16.msra.mxu0 %v1941_v36  ;;  %1893 = vmatpush3.bf16.msra.mxu1 %v1971_v48 }
  0x75   :  { %1894 = vmatprep.subr.bf16.mxu1 %v2269_v17 }
  0x76   :  { %646 = vbcast.lane.b32.xlu1 %v640_v31, 264  ;;  %642 = vbcast.lane.b32.xlu0 %v640_v31, 256 }
  0x77   :  { %409 = vmatmul.mubr.bf16.vlgmr.msra.gmra.mxu0 %v1942_v37 }
  0x78   :  { %416 = vmatprep.mubr.bf16.mxu0 %v1945_v39  ;;  %1895 = vmatpush3.bf16.msra.mxu1 %v1972_v49 }
  0x79   :  { %1896 = vmatprep.subr.bf16.mxu1 %v2269_v17 }
  0x7a   :  { %657 = vbcast.lane.b32.xlu1 %v651_v35, 264  ;;  %653 = vbcast.lane.b32.xlu0 %v651_v35, 256 }
  0x7c   :  { %1897 = vmatpush3.bf16.msra.mxu1 %v1973_v52 }
  0x7f   :  { %417 = vmatmul.mubr.bf16.gmra.mxu0 %v1947_v41  ;;  %v565_v41 = vld [vmem:[#allocation7 + $0x58] sm:$0xff] }
  0x80   :  { %424 = vmatprep.mubr.bf16.mxu0 %v1948_v43  ;;  %v564_v43 = vld [vmem:[#allocation7 + $0x50] sm:$0xff] }
  0x87   :  { %425 = vmatmul.mubr.bf16.gmra.mxu0 %v1950_v46 }
  0x88   :  { %432 = vmatprep.mubr.bf16.mxu0 %v1951_v47 }
  0x8f   :  { %433 = vmatmul.mubr.bf16.gmra.mxu0 %v1953_v50 }
  0x90   :  { %440 = vmatprep.mubr.bf16.mxu0 %v1954_v51 }
  0x97   :  { %441 = vmatmul.mubr.bf16.gmra.mxu0 %v1956_v53 }
  0x98   :  { %448 = vmatprep.mubr.bf16.mxu0 %v1957_v54  ;;  %v567_v54 = vld [vmem:[#allocation7 + $0x68] sm:$0xff] }
  0x9f   :  { %449 = vmatmul.mubr.bf16.gmra.mxu0 %v1959_v55  ;;  %v566_v55 = vld [vmem:[#allocation7 + $0x60] sm:$0xff] }
  0xa0   :  { %456 = vmatprep.mubr.bf16.mxu0 %v1960_v56 }
  0xa7   :  { %457 = vmatmul.mubr.bf16.gmra.mxu0 %v1962_v57 }
  0xa8   :  { %464 = vmatprep.mubr.bf16.mxu0 %v1963_v58 }
  0xaf   :  { %465 = vmatmul.mubr.bf16.gmra.mxu0 %v1965_v59 }
  0xd0   :  { %v588_v60 = vpop.permute.xlu1 %587  ;;  %v577_v61 = vpop.permute.xlu0 %576 }
  0xd1   :  { %v661_v6 = vmul.f32 %v588_v60, %v556_v62  ;;  %v659_v7 = vmul.f32 %v577_v61, %v554_v63 }
  0xd4   :  { %v592_v4 = vpop.permute.xlu1 %591  ;;  %v581_v5 = vpop.permute.xlu0 %580 }
  0xd5   :  { %v662_v8 = vmul.f32 %v592_v4, %v557_v0  ;;  %v660_v9 = vmul.f32 %v581_v5, %v555_v1 }
  0xd7   :  { %v682_v12 = vadd.f32 %v662_v8, %v661_v6  ;;  %v675_v13 = vadd.f32 %v660_v9, %v659_v7  ;;  %v569_v6 = vld [vmem:[#allocation7 + $0x78] sm:$0xff]  ;;  %v568_v7 = vld [vmem:[#allocation7 + $0x70] sm:$0xff] }
  0xd8   :  { %v603_v14 = vpop.permute.xlu1 %602  ;;  %v599_v15 = vpop.permute.xlu0 %598 }
  0xd9   :  { %v664_v16 = vmul.f32 %v603_v14, %v559_v10  ;;  %v663_v18 = vmul.f32 %v599_v15, %v558_v11  ;;  %v683_v19 = vrot.slane %v682_v12, 4  ;;  %v676_v21 = vrot.slane %v675_v13, 4 }
  0xdb   :  { %v689_v22 = vadd.f32 %v664_v16, %v663_v18  ;;  %v684_v28 = vadd.f32 %v683_v19, %v682_v12  ;;  %v677_v31 = vadd.f32 %v676_v21, %v675_v13 }
  0xdc   :  { %v614_v24 = vpop.permute.xlu1 %613  ;;  %v610_v25 = vpop.permute.xlu0 %609 }
  0xdd   :  { %v690_v26 = vrot.slane %v689_v22, 4  ;;  %v666_v27 = vmul.f32 %v614_v24, %v561_v20  ;;  %v665_v29 = vmul.f32 %v610_v25, %v560_v23  ;;  %v685_v38 = vrot.slane %v684_v28, 2 }
  0xde   :  { %v678_v42 = vrot.slane %v677_v31, 2 }
  0xdf   :  { %v691_v33 = vadd.f32 %v690_v26, %v689_v22  ;;  %v696_v34 = vadd.f32 %v666_v27, %v665_v29  ;;  %v686_v50 = vadd.f32 %v685_v38, %v684_v28 }
  0xe0   :  { %v625_v35 = vpop.permute.xlu1 %624  ;;  %v621_v36 = vpop.permute.xlu0 %620  ;;  %v679_v56 = vadd.f32 %v678_v42, %v677_v31 }
  0xe1   :  { %v668_v37 = vmul.f32 %v625_v35, %v563_v30  ;;  %v697_v39 = vrot.slane %v696_v34, 4  ;;  %v667_v40 = vmul.f32 %v621_v36, %v562_v32  ;;  %v692_v44 = vrot.slane %v691_v33, 2 }
  0xe2   :  { %v687_v1 = vrot.slane %v686_v50, 1  ;;  %v680_v8 = vrot.slane %v679_v56, 1 }
  0xe3   :  { %v698_v45 = vadd.f32 %v697_v39, %v696_v34  ;;  %v703_v46 = vadd.f32 %v668_v37, %v667_v40  ;;  %v693_v57 = vadd.f32 %v692_v44, %v691_v33 }
  0xe4   :  { %v636_v47 = vpop.permute.xlu1 %635  ;;  %v632_v48 = vpop.permute.xlu0 %631  ;;  %v688_v20 = vadd.f32 %v687_v1, %v686_v50  ;;  %v681_v23 = vadd.f32 %v680_v8, %v679_v56  ;;  %v1982_v8 = vld [vmem:[#allocation11 + $0x54] ss:$8 sps:$4 sm:$0xff]  }
  0xe5   :  { %v670_v49 = vmul.f32 %v636_v47, %v565_v41  ;;  %v699_v51 = vrot.slane %v698_v45, 2  ;;  %v704_v52 = vrot.slane %v703_v46, 4  ;;  %v669_v53 = vmul.f32 %v632_v48, %v564_v43 }
  0xe6   :  { %v694_v10 = vrot.slane %v693_v57, 1  ;;  %v732_v31 = vpack.c.bf16 %v688_v20, %v688_v20  ;;  %v731_v34 = vpack.c.bf16 %v681_v23, %v681_v23  ;;  %v1995_v20 = vld [vmem:[#allocation11] ss:$8 sps:$4 sm:$0xff]  }
  0xe7   :  { %v705_v58 = vadd.f32 %v704_v52, %v703_v46  ;;  %v710_v59 = vadd.f32 %v670_v49, %v669_v53  ;;  %v700_v62 = vadd.f32 %v699_v51, %v698_v45 }
  0xe8   :  { %v647_v60 = vpop.permute.xlu1 %646  ;;  %v643_v61 = vpop.permute.xlu0 %642  ;;  %v695_v26 = vadd.f32 %v694_v10, %v693_v57  ;;  %v771_v42 = vunpack.c.l.b16 %v732_v31  ;;  %v770_v44 = vunpack.c.l.b16 %v731_v34  ;;  %v1985_v10 = vld [vmem:[#allocation11 + $0x44] ss:$8 sps:$4 sm:$0xff]   ;;  %v2006_v31 = vld [vmem:[#allocation11 + $0xd4] ss:$8 sps:$4 sm:$0xff]  }
  0xe9   :  { %v672_v63 = vmul.f32 %v647_v60, %v567_v54  ;;  %v671_v0 = vmul.f32 %v643_v61, %v566_v55  ;;  %v706_v4 = vrot.slane %v705_v58, 2  ;;  %v711_v5 = vrot.slane %v710_v59, 4 }
  0xea   :  { %v701_v15 = vrot.slane %v700_v62, 1  ;;  %v733_v37 = vpack.c.bf16 %v695_v26, %v695_v26  ;;  %v779_v53 = vsel %vm778_vm1, %v771_v42, %v770_v44  ;;  %v1998_v26 = vld [vmem:[#allocation11 + $0xf0] ss:$8 sps:$4 sm:$0xff]   ;;  %v2018_v42 = vld [vmem:[#allocation11 + $0x94] ss:$8 sps:$4 sm:$0xff]  }
  0xeb   :  { %v717_v9 = vadd.f32 %v672_v63, %v671_v0  ;;  %v707_v11 = vadd.f32 %v706_v4, %v705_v58  ;;  %v712_v12 = vadd.f32 %v711_v5, %v710_v59  ;;  %v1974_v4 = vld [vmem:[#allocation11 + $0x70] ss:$8 sps:$4 sm:$0xff]   ;;  %v1976_v5 = vld [vmem:[#allocation11 + $0x74] ss:$8 sps:$4 sm:$0xff]  }
  0xec   :  { %v658_v13 = vpop.permute.xlu1 %657  ;;  %v654_v14 = vpop.permute.xlu0 %653  ;;  %v702_v28 = vadd.f32 %v701_v15, %v700_v62  ;;  %v772_v48 = vunpack.c.l.b16 %v733_v37  ;;  %1113 = vmatprep.subr.bf16.mxu0 %v1976_v5  ;;  %v1989_v15 = vld [vmem:[#allocation11 + $0x20] ss:$8 sps:$4 sm:$0xff]   ;;  %v2016_v44 = vld [vmem:[#allocation11 + $0x90] ss:$8 sps:$4 sm:$0xff]  }
  0xed   :  { %v718_v16 = vrot.slane %v717_v9, 4  ;;  %v674_v18 = vmul.f32 %v658_v13, %v569_v6  ;;  %v673_v19 = vmul.f32 %v654_v14, %v568_v7  ;;  %v708_v21 = vrot.slane %v707_v11, 1  ;;  %v1979_v6 = vld [vmem:[#allocation11 + $0x64] ss:$8 sps:$4 sm:$0xff]   ;;  %1114 = vmatpush1.bf16.msra.mxu0 %v1974_v4  ;;  %v1977_v7 = vld [vmem:[#allocation11 + $0x60] ss:$8 sps:$4 sm:$0xff]  }
  0xee   :  { %v713_v22 = vrot.slane %v712_v12, 2  ;;  %v734_v39 = vpack.c.bf16 %v702_v28, %v702_v28  ;;  %v781_v56 = vsel %vm780_vm2, %v772_v48, %v779_v53  ;;  %1115 = vmatprep.subr.bf16.mxu0 %v1979_v6  ;;  %v1986_v13 = vld [vmem:[#allocation11 + $0x30] ss:$8 sps:$4 sm:$0xff]   ;;  %v1991_v14 = vld [vmem:[#allocation11 + $0x24] ss:$8 sps:$4 sm:$0xff]  }
  0xef   :  { %v719_v24 = vadd.f32 %v718_v16, %v717_v9  ;;  %v724_v25 = vadd.f32 %v674_v18, %v673_v19  ;;  %v709_v32 = vadd.f32 %v708_v21, %v707_v11  ;;  %v1980_v9 = vld [vmem:[#allocation11 + $0x50] ss:$8 sps:$4 sm:$0xff]   ;;  %v1983_v11 = vld [vmem:[#allocation11 + $0x40] ss:$8 sps:$4 sm:$0xff]   ;;  %v1994_v16 = vld [vmem:[#allocation11 + $0x14] ss:$8 sps:$4 sm:$0xff]  }
  0xf0   :  { %v714_v27 = vadd.f32 %v713_v22, %v712_v12  ;;  %v773_v49 = vunpack.c.l.b16 %v734_v39  ;;  %v1988_v12 = vld [vmem:[#allocation11 + $0x34] ss:$8 sps:$4 sm:$0xff]   ;;  %v1992_v18 = vld [vmem:[#allocation11 + $0x10] ss:$8 sps:$4 sm:$0xff]   ;;  %v1997_v19 = vld [vmem:[#allocation11 + $0x4] ss:$8 sps:$4 sm:$0xff]  }
  0xf1   :  { %v720_v29 = vrot.slane %v719_v24, 2  ;;  %v725_v30 = vrot.slane %v724_v25, 4  ;;  %v735_v43 = vpack.c.bf16 %v709_v32, %v709_v32  ;;  %1116 = vmatpush1.bf16.msra.mxu0 %v1977_v7  ;;  %v2003_v28 = vld [vmem:[#allocation11 + $0xe4] ss:$8 sps:$4 sm:$0xff]   ;;  %v2004_v32 = vld [vmem:[#allocation11 + $0xd0] ss:$8 sps:$4 sm:$0xff]  }
  0xf2   :  { %v715_v33 = vrot.slane %v714_v27, 1  ;;  %v783_v59 = vsel %vm782_vm3, %v773_v49, %v781_v56  ;;  %1117 = vmatprep.subr.bf16.mxu0 %v1982_v8  ;;  %v2015_v39 = vld [vmem:[#allocation11 + $0xa4] ss:$8 sps:$4 sm:$0xff]   ;;  %v2037_v4 = vld [vmem:[#allocation13 + $0x20] ss:$8 sps:$4 sm:$0xff]  }
  0xf3   :  { %v721_v35 = vadd.f32 %v720_v29, %v719_v24  ;;  %v726_v36 = vadd.f32 %v725_v30, %v724_v25  ;;  %v774_v52 = vunpack.c.l.b16 %v735_v43  ;;  %v2000_v25 = vld [vmem:[#allocation11 + $0xf4] ss:$8 sps:$4 sm:$0xff]   ;;  %v2001_v30 = vld [vmem:[#allocation11 + $0xe0] ss:$8 sps:$4 sm:$0xff]  }
  0xf4   :  { %v716_v38 = vadd.f32 %v715_v33, %v714_v27  ;;  %v2009_v33 = vld [vmem:[#allocation11 + $0xc4] ss:$8 sps:$4 sm:$0xff]  }
  0xf5   :  { %v722_v40 = vrot.slane %v721_v35, 1  ;;  %v727_v41 = vrot.slane %v726_v36, 2  ;;  %v785_v60 = vsel %vm784_vm4, %v774_v52, %v783_v59  ;;  %1118 = vmatpush1.bf16.msra.mxu0 %v1980_v9  ;;  %v2027_v52 = vld [vmem:[#allocation13 + $0x64] ss:$8 sps:$4 sm:$0xff]  }
  0xf6   :  { %v736_v45 = vpack.c.bf16 %v716_v38, %v716_v38  ;;  %1119 = vmatprep.subr.bf16.mxu0 %v1985_v10  ;;  %v2010_v38 = vld [vmem:[#allocation11 + $0xb0] ss:$8 sps:$4 sm:$0xff]  }
  0xf7   :  { %v723_v46 = vadd.f32 %v722_v40, %v721_v35  ;;  %v728_v47 = vadd.f32 %v727_v41, %v726_v36  ;;  %v2007_v35 = vld [vmem:[#allocation11 + $0xc0] ss:$8 sps:$4 sm:$0xff]   ;;  %v2012_v36 = vld [vmem:[#allocation11 + $0xb4] ss:$8 sps:$4 sm:$0xff]  }
  0xf8   :  { %v775_v54 = vunpack.c.l.b16 %v736_v45  ;;  %v2013_v41 = vld [vmem:[#allocation11 + $0xa0] ss:$8 sps:$4 sm:$0xff]   ;;  %v2021_v45 = vld [vmem:[#allocation11 + $0x84] ss:$8 sps:$4 sm:$0xff]  }
  0xf9   :  { %v737_v50 = vpack.c.bf16 %v723_v46, %v723_v46  ;;  %v729_v51 = vrot.slane %v728_v47, 1  ;;  %1120 = vmatpush1.bf16.msra.mxu0 %v1983_v11 }
  0xfa   :  { %v787_v62 = vsel %vm786_vm5, %v775_v54, %v785_v60  ;;  %1121 = vmatprep.subr.bf16.mxu0 %v1988_v12  ;;  %v2025_v54 = vld [vmem:[#allocation13 + $0x60] ss:$8 sps:$4 sm:$0xff]  }
  0xfb   :  { %v730_v55 = vadd.f32 %v729_v51, %v728_v47  ;;  %v776_v57 = vunpack.c.l.b16 %v737_v50  ;;  %v2019_v47 = vld [vmem:[#allocation11 + $0x80] ss:$8 sps:$4 sm:$0xff]   ;;  %v2022_v50 = vld [vmem:[#allocation13 + $0x70] ss:$8 sps:$4 sm:$0xff]   ;;  %v2024_v51 = vld [vmem:[#allocation13 + $0x74] ss:$8 sps:$4 sm:$0xff]  }
  0xfc   :  { %1398 = vmatprep.subr.bf16.mxu1 %v2024_v51  ;;  %v2031_v60 = vld [vmem:[#allocation13 + $0x40] ss:$8 sps:$4 sm:$0xff]  }
  0xfd   :  { %v738_v58 = vpack.c.bf16 %v730_v55, %v730_v55  ;;  %v789_v63 = vsel %vm788_vm6, %v776_v57, %v787_v62  ;;  %1122 = vmatpush1.bf16.msra.mxu0 %v1986_v13  ;;  %v2030_v55 = vld [vmem:[#allocation13 + $0x54] ss:$8 sps:$4 sm:$0xff]   ;;  %v2028_v57 = vld [vmem:[#allocation13 + $0x50] ss:$8 sps:$4 sm:$0xff]  }
  0xfe   :  { %1123 = vmatprep.subr.bf16.mxu0 %v1991_v14 }
  0xff   :  { %v777_v61 = vunpack.c.l.b16 %v738_v58  ;;  %v2033_v58 = vld [vmem:[#allocation13 + $0x44] ss:$8 sps:$4 sm:$0xff]  }
 0x101   :  { %v791_v0 = vsel %vm790_vm7, %v777_v61, %v789_v63  ;;  %1124 = vmatpush1.bf16.msra.mxu0 %v1989_v15  ;;  %v2036_v61 = vld [vmem:[#allocation13 + $0x34] ss:$8 sps:$4 sm:$0xff]   ;;  %v2034_v63 = vld [vmem:[#allocation13 + $0x30] ss:$8 sps:$4 sm:$0xff]  }
 0x102   :  { %v792_v1 = vpack.c.b16 %v791_v0, %v791_v0  ;;  %1125 = vmatprep.subr.bf16.mxu0 %v1994_v16  ;;  %v2039_v0 = vld [vmem:[#allocation13 + $0x24] ss:$8 sps:$4 sm:$0xff]  }
 0x104   :  { %1899 = vmatmul.mubr.bf16.vlgmr.msra.gmra.mxu1 %v792_v1 }
 0x105   :  { %1126 = vmatpush1.bf16.msra.mxu0 %v1992_v18  ;;  %1399 = vmatpush1.bf16.msra.mxu1 %v2022_v50 }
 0x106   :  { %1127 = vmatprep.subr.bf16.mxu0 %v1997_v19  ;;  %1400 = vmatprep.subr.bf16.mxu1 %v2027_v52 }
 0x109   :  { %1128 = vmatpush1.bf16.msra.mxu0 %v1995_v20  ;;  %1401 = vmatpush1.bf16.msra.mxu1 %v2025_v54  ;;  %v1697_v20 = vld [vmem:[%s2500_s2] ss:$0 sm:$0xff] }
 0x10a   :  { %1129 = vmatprep.subr.bf16.mxu0 %v2000_v25  ;;  %1402 = vmatprep.subr.bf16.mxu1 %v2030_v55 }
 0x10d   :  { %1130 = vmatpush2.bf16.msra.mxu0 %v1998_v26  ;;  %1403 = vmatpush1.bf16.msra.mxu1 %v2028_v57 }
 0x10e   :  { %1131 = vmatprep.subr.bf16.mxu0 %v2003_v28  ;;  %1404 = vmatprep.subr.bf16.mxu1 %v2033_v58 }
 0x111   :  { %1132 = vmatpush2.bf16.msra.mxu0 %v2001_v30  ;;  %1405 = vmatpush1.bf16.msra.mxu1 %v2031_v60 }
 0x112   :  { %1133 = vmatprep.subr.bf16.mxu0 %v2006_v31  ;;  %1406 = vmatprep.subr.bf16.mxu1 %v2036_v61 }
 0x115   :  { %1134 = vmatpush2.bf16.msra.mxu0 %v2004_v32  ;;  %1407 = vmatpush1.bf16.msra.mxu1 %v2034_v63 }
 0x116   :  { %1135 = vmatprep.subr.bf16.mxu0 %v2009_v33  ;;  %1408 = vmatprep.subr.bf16.mxu1 %v2039_v0 }
 0x119   :  { %1136 = vmatpush2.bf16.msra.mxu0 %v2007_v35  ;;  %1409 = vmatpush1.bf16.msra.mxu1 %v2037_v4 }
 0x11a   :  { %1137 = vmatprep.subr.bf16.mxu0 %v2012_v36 }
 0x11d   :  { %1138 = vmatpush2.bf16.msra.mxu0 %v2010_v38 }
 0x11e   :  { %1139 = vmatprep.subr.bf16.mxu0 %v2015_v39 }
 0x121   :  { %1140 = vmatpush2.bf16.msra.mxu0 %v2013_v41 }
 0x122   :  { %1141 = vmatprep.subr.bf16.mxu0 %v2018_v42 }
 0x125   :  { %1142 = vmatpush2.bf16.msra.mxu0 %v2016_v44 }
 0x126   :  { %1143 = vmatprep.subr.bf16.mxu0 %v2021_v45 }
 0x129   :  { %1144 = vmatpush2.bf16.msra.mxu0 %v2019_v47 }
 0x12a   :  { %1902 = vmatprep.subr.bf16.mxu0 %v2269_v17 }
 0x137   :  { %v2424_v21 = vpop.f32.mrf.mxu0 }
 0x139   :  { %v2426_v22 = vpop.f32.mrf.mxu0 }
 0x13a   :  { %v1825_v15 = vadd.f32 %v2426_v22, %v2424_v21 }
 0x13b   :  { %v2428_v23 = vpop.f32.mrf.mxu0 }
 0x13c   :  { %v411_v30 = vadd.f32 %v1825_v15, %v1697_v20 }
 0x13d   :  { %v2430_v24 = vpop.f32.mrf.mxu0 }
 0x13e   :  { %v1828_v16 = vadd.f32 %v2430_v24, %v2428_v23 }
 0x13f   :  { %v2432_v27 = vpop.f32.mrf.mxu0 }
 0x140   :  { %v414_v31 = vadd.f32 %v1828_v16, %v1697_v20 }
 0x141   :  { %v2434_v29 = vpop.f32.mrf.mxu0 }
 0x142   :  { %v1831_v18 = vadd.f32 %v2434_v29, %v2432_v27  ;;  %v473_v27 = vmax.f32 %v411_v30, 0.0  ;;  %v474_v29 = vmax.f32 %v414_v31, 0.0 }
 0x143   :  { %v2436_v34 = vpop.f32.mrf.mxu0 }
 0x144   :  { %v419_v32 = vadd.f32 %v1831_v18, %v1697_v20  ;;  %v489_v44 = vadd.f32 %v474_v29, %v473_v27 }
 0x145   :  { %v2438_v37 = vpop.f32.mrf.mxu0 }
 0x146   :  { %v1834_v19 = vadd.f32 %v2438_v37, %v2436_v34  ;;  %v475_v36 = vmax.f32 %v419_v32, 0.0 }
 0x147   :  { %v1835_v40 = vpop.f32.mrf.mxu0 }
 0x148   :  { %v422_v21 = vadd.f32 %v1834_v19, %v1697_v20 }
 0x149   :  { %v1836_v43 = vpop.f32.mrf.mxu0 }
 0x14a   :  { %v1837_v25 = vadd.f32 %v1836_v43, %v1835_v40  ;;  %v476_v34 = vmax.f32 %v422_v21, 0.0 }
 0x14b   :  { %v1838_v46 = vpop.f32.mrf.mxu0 }
 0x14c   :  { %v427_v23 = vadd.f32 %v1837_v25, %v1697_v20  ;;  %v496_v45 = vadd.f32 %v476_v34, %v475_v36  ;;  %v1730_v36 = vld [vmem:[%s2504_s6] ss:$0 sm:$0xff] }
 0x14d   :  { %v1839_v48 = vpop.f32.mrf.mxu0 }
 0x14e   :  { %v1840_v26 = vadd.f32 %v1839_v48, %v1838_v46  ;;  %v477_v40 = vmax.f32 %v427_v23, 0.0  ;;  %v497_v57 = vrot.slane %v496_v45, 4 }
 0x14f   :  { %v1841_v49 = vpop.f32.mrf.mxu0 }
 0x150   :  { %v430_v24 = vadd.f32 %v1840_v26, %v1697_v20 }
 0x151   :  { %v1842_v53 = vpop.f32.mrf.mxu0 }
 0x152   :  { %v1843_v22 = vadd.f32 %v1842_v53, %v1841_v49  ;;  %v478_v42 = vmax.f32 %v430_v24, 0.0 }
 0x153   :  { %v1844_v56 = vpop.f32.mrf.mxu0 }
 0x154   :  { %v435_v39 = vadd.f32 %v1843_v22, %v1697_v20  ;;  %v503_v52 = vadd.f32 %v478_v42, %v477_v40 }
 0x155   :  { %v1845_v59 = vpop.f32.mrf.mxu0 }
 0x156   :  { %v1846_v33 = vadd.f32 %v1845_v59, %v1844_v56  ;;  %v479_v50 = vmax.f32 %v435_v39, 0.0  ;;  %v490_v56 = vrot.slane %v489_v44, 4 }
 0x157   :  { %v1847_v62 = vpop.f32.mrf.mxu0 }
 0x158   :  { %v438_v41 = vadd.f32 %v1846_v33, %v1697_v20 }
 0x159   :  { %v1848_v1 = vpop.f32.mrf.mxu0 }
 0x15a   :  { %v1849_v37 = vadd.f32 %v1848_v1, %v1847_v62  ;;  %v480_v51 = vmax.f32 %v438_v41, 0.0  ;;  %v504_v1 = vrot.slane %v503_v52, 4 }
 0x15b   :  { %v1850_v5 = vpop.f32.mrf.mxu0 }
 0x15c   :  { %v443_v48 = vadd.f32 %v1849_v37, %v1697_v20  ;;  %v510_v62 = vadd.f32 %v480_v51, %v479_v50 }
 0x15d   :  { %v1851_v6 = vpop.f32.mrf.mxu0 }
 0x15e   :  { %v1852_v38 = vadd.f32 %v1851_v6, %v1850_v5  ;;  %v481_v60 = vmax.f32 %v443_v48, 0.0  ;;  %v491_v6 = vadd.f32 %v490_v56, %v489_v44 }
 0x15f   :  { %v1853_v7 = vpop.f32.mrf.mxu0 }
 0x160   :  { %v446_v49 = vadd.f32 %v1852_v38, %v1697_v20  ;;  %v492_v18 = vrot.slane %v491_v6, 2 }
 0x161   :  { %v1854_v8 = vpop.f32.mrf.mxu0 }
 0x162   :  { %v1855_v46 = vadd.f32 %v1854_v8, %v1853_v7  ;;  %v482_v61 = vmax.f32 %v446_v49, 0.0  ;;  %v498_v7 = vadd.f32 %v497_v57, %v496_v45  ;;  %v493_v22 = vadd.f32 %v492_v18, %v491_v6 }
 0x163   :  { %v1856_v9 = vpop.f32.mrf.mxu0 }
 0x164   :  { %v451_v58 = vadd.f32 %v1855_v46, %v1697_v20  ;;  %v499_v19 = vrot.slane %v498_v7, 2  ;;  %v494_v34 = vrot.slane %v493_v22, 1 }
 0x165   :  { %v1857_v10 = vpop.f32.mrf.mxu0 }
 0x166   :  { %v1858_v47 = vadd.f32 %v1857_v10, %v1856_v9  ;;  %v483_v8 = vmax.f32 %v451_v58, 0.0  ;;  %v517_v10 = vadd.f32 %v482_v61, %v481_v60  ;;  %v500_v33 = vadd.f32 %v499_v19, %v498_v7 }
 0x167   :  { %v1859_v11 = vpop.f32.mrf.mxu0 }
 0x168   :  { %v454_v59 = vadd.f32 %v1858_v47, %v1697_v20  ;;  %v518_v26 = vrot.slane %v517_v10, 4  ;;  %v501_v37 = vrot.slane %v500_v33, 1  ;;  %v495_v47 = vadd.f32 %v494_v34, %v493_v22  ;;  %v2040_v34 = vld [vmem:[#allocation13 + $0x10] ss:$8 sps:$4 sm:$0xff]  }
 0x169   :  { %v1860_v12 = vpop.f32.mrf.mxu0 }
 0x16a   :  { %v1861_v53 = vadd.f32 %v1860_v12, %v1859_v11  ;;  %v484_v9 = vmax.f32 %v454_v59, 0.0  ;;  %v511_v11 = vrot.slane %v510_v62, 4  ;;  %v519_v24 = vadd.f32 %v518_v26, %v517_v10 }
 0x16b   :  { %v1862_v13 = vpop.f32.mrf.mxu0  ;;  %v502_v48 = vadd.f32 %v501_v37, %v500_v33  ;;  %v546_v59 = vmul.f32 0.0625, %v495_v47  ;;  %v2045_v37 = vld [vmem:[#allocation13 + $0x4] ss:$8 sps:$4 sm:$0xff]   ;;  %v2058_v47 = vld [vmem:[#allocation13 + $0xb0] ss:$8 sps:$4 sm:$0xff]  }
 0x16c   :  { %v459_v4 = vadd.f32 %v1861_v53, %v1697_v20  ;;  %v524_v25 = vadd.f32 %v484_v9, %v483_v8  ;;  %v520_v39 = vrot.slane %v519_v24, 2 }
 0x16d   :  { %v1863_v14 = vpop.f32.mrf.mxu0  ;;  %v547_v60 = vmul.f32 0.0625, %v502_v48  ;;  %v2063_v48 = vld [vmem:[#allocation13 + $0xa4] ss:$8 sps:$4 sm:$0xff]  }
 0x16e   :  { %v1864_v54 = vadd.f32 %v1863_v14, %v1862_v13  ;;  %v505_v14 = vadd.f32 %v504_v1, %v503_v52  ;;  %v485_v15 = vmax.f32 %v459_v4, 0.0  ;;  %v525_v23 = vrot.slane %v524_v25, 4 }
 0x16f   :  { %v1865_v28 = vpop.f32.mrf.mxu0  ;;  %v521_v51 = vadd.f32 %v520_v39, %v519_v24  ;;  %v899_v7 = vsel %vm778_vm1, %v547_v60, %v546_v59  ;;  %v2048_v39 = vld [vmem:[#allocation13 + $0xf4] ss:$8 sps:$4 sm:$0xff]  }
 0x170   :  { %v462_v5 = vadd.f32 %v1864_v54, %v1697_v20  ;;  %v506_v32 = vrot.slane %v505_v14, 2  ;;  %v526_v38 = vadd.f32 %v525_v23, %v524_v25 }
 0x171   :  { %v1866_v35 = vpop.f32.mrf.mxu0 }
 0x172   :  { %v1867_v63 = vadd.f32 %v1866_v35, %v1865_v28  ;;  %v486_v16 = vmax.f32 %v462_v5, 0.0  ;;  %v512_v28 = vadd.f32 %v511_v11, %v510_v62  ;;  %v507_v29 = vadd.f32 %v506_v32, %v505_v14 }
 0x173   :  { %v1868_v43 = vpop.f32.mrf.mxu0  ;;  %v527_v49 = vrot.slane %v526_v38, 2 }
 0x174   :  { %v467_v12 = vadd.f32 %v1867_v63, %v1697_v20  ;;  %v531_v21 = vadd.f32 %v486_v16, %v485_v15  ;;  %v513_v35 = vrot.slane %v512_v28, 2  ;;  %v508_v44 = vrot.slane %v507_v29, 1 }
 0x175   :  { %v1869_v55 = vpop.f32.mrf.mxu0  ;;  %v528_v61 = vadd.f32 %v527_v49, %v526_v38  ;;  %v522_v63 = vrot.slane %v521_v51, 1  ;;  %v2043_v38 = vld [vmem:[#allocation13] ss:$8 sps:$4 sm:$0xff]  }
 0x176   :  { %v1870_v0 = vadd.f32 %v1869_v55, %v1868_v43  ;;  %v487_v30 = vmax.f32 %v467_v12, 0.0  ;;  %v514_v40 = vadd.f32 %v513_v35, %v512_v28  ;;  %v509_v56 = vadd.f32 %v508_v44, %v507_v29  ;;  %v2052_v44 = vld [vmem:[#allocation13 + $0xd0] ss:$8 sps:$4 sm:$0xff]   ;;  %v2061_v49 = vld [vmem:[#allocation13 + $0xa0] ss:$8 sps:$4 sm:$0xff]  }
 0x177   :  { %v529_v8 = vrot.slane %v528_v61, 1  ;;  %v523_v10 = vadd.f32 %v522_v63, %v521_v51  ;;  %v2064_v51 = vld [vmem:[#allocation13 + $0x90] ss:$8 sps:$4 sm:$0xff]  }
 0x178   :  { %v470_v13 = vadd.f32 %v1870_v0, %v1697_v20  ;;  %v532_v20 = vrot.slane %v531_v21, 4  ;;  %v515_v53 = vrot.slane %v514_v40, 1  ;;  %v548_v5 = vmul.f32 0.0625, %v509_v56 }
 0x179   :  { %v530_v15 = vadd.f32 %v529_v8, %v528_v61  ;;  %v550_v16 = vmul.f32 0.0625, %v523_v10 }
 0x17a   :  { %v488_v31 = vmax.f32 %v470_v13, 0.0  ;;  %v533_v45 = vadd.f32 %v532_v20, %v531_v21  ;;  %v516_v0 = vadd.f32 %v515_v53, %v514_v40  ;;  %v900_v13 = vsel %vm780_vm2, %v548_v5, %v899_v7  ;;  %v2051_v40 = vld [vmem:[#allocation13 + $0xe4] ss:$8 sps:$4 sm:$0xff]   ;;  %v2067_v53 = vld [vmem:[#allocation13 + $0x80] ss:$8 sps:$4 sm:$0xff]  }
 0x17b   :  { %v551_v26 = vmul.f32 0.0625, %v530_v15 }
 0x17c   :  { %v538_v27 = vadd.f32 %v488_v31, %v487_v30  ;;  %v534_v57 = vrot.slane %v533_v45, 2  ;;  %v549_v11 = vmul.f32 0.0625, %v516_v0 }
 0x17e   :  { %v539_v42 = vrot.slane %v538_v27, 4  ;;  %v535_v6 = vadd.f32 %v534_v57, %v533_v45  ;;  %v901_v18 = vsel %vm782_vm3, %v549_v11, %v900_v13  ;;  %v2055_v45 = vld [vmem:[#allocation13 + $0xc0] ss:$8 sps:$4 sm:$0xff]  }
 0x17f   :  { %v902_v28 = vsel %vm784_vm4, %v550_v16, %v901_v18 }
 0x180   :  { %v540_v54 = vadd.f32 %v539_v42, %v538_v27  ;;  %v536_v14 = vrot.slane %v535_v6, 1  ;;  %v903_v32 = vsel %vm786_vm5, %v551_v26, %v902_v28  ;;  %v2049_v42 = vld [vmem:[#allocation13 + $0xe0] ss:$8 sps:$4 sm:$0xff]  }
 0x182   :  { %v541_v1 = vrot.slane %v540_v54, 2  ;;  %v537_v25 = vadd.f32 %v536_v14, %v535_v6 }
 0x184   :  { %v542_v12 = vadd.f32 %v541_v1, %v540_v54  ;;  %v552_v31 = vmul.f32 0.0625, %v537_v25  ;;  %v941_v54 = vld [vmem:[%s2506_s8] sm:$0x3] }
 0x185   :  { %v950_v56 = vrot.slane %v941_v54, %v2394_v2 }
 0x186   :  { %v543_v19 = vrot.slane %v542_v12, 1  ;;  %v904_v33 = vsel %vm788_vm6, %v552_v31, %v903_v32 }
 0x188   :  { %v544_v30 = vadd.f32 %v543_v19, %v542_v12 }
 0x18a   :  { %v553_v21 = vmul.f32 0.0625, %v544_v30 }
 0x18c   :  { %v905_v27 = vsel %vm790_vm7, %v553_v21, %v904_v33 }
 0x18d   :  { %v907_v20 = vpack.c.bf16 %v2269_v17, %v905_v27 }
 0x1c4   :  { %v876_v41 = vpop.f32.mrf.mxu1 }
 0x1c5   :  { %v877_v43 = vadd.f32 %v1730_v36, %v876_v41  ;;  %v2042_v36 = vld [vmem:[#allocation13 + $0x14] ss:$8 sps:$4 sm:$0xff]   ;;  %v2046_v41 = vld [vmem:[#allocation13 + $0xf0] ss:$8 sps:$4 sm:$0xff]  }
 0x1c6   :  { %v1900_v46 = vpop.f32.mrf.mxu1  ;;  %1410 = vmatprep.subr.bf16.mxu1 %v2042_v36 }
 0x1c7   :  { %v883_v50 = vmul.f32 0.044715, %v877_v43  ;;  %v882_v23 = vmul.f32 0.5, %v877_v43  ;;  %1411 = vmatpush1.bf16.msra.mxu1 %v2040_v34  ;;  %v2060_v46 = vld [vmem:[#allocation13 + $0xb4] ss:$8 sps:$4 sm:$0xff]  }
 0x1c8   :  { %v879_v52 = vpop.f32.mrf.mxu1  ;;  %1412 = vmatprep.subr.bf16.mxu1 %v2045_v37 }
 0x1c9   :  { %v884_v55 = vmul.f32 %v883_v50, %v877_v43  ;;  %v2066_v50 = vld [vmem:[#allocation13 + $0x94] ss:$8 sps:$4 sm:$0xff]   ;;  %v2069_v52 = vld [vmem:[#allocation13 + $0x84] ss:$8 sps:$4 sm:$0xff]  }
 0x1ca   :  { %v1901_v58 = vpop.f32.mrf.mxu1 }
 0x1cb   :  { %v885_v62 = vmul.f32 %v884_v55, %v877_v43  ;;  %1413 = vmatpush1.bf16.msra.mxu1 %v2043_v38  ;;  %v946_v55 = vrot.slane %v941_v54, %v2397_v3 }
 0x1cc   :  { %1414 = vmatprep.subr.bf16.mxu1 %v2048_v39 }
 0x1cd   :  { %v886_v4 = vadd.f32 %v885_v62, %v877_v43  ;;  %v2054_v43 = vld [vmem:[#allocation13 + $0xd4] ss:$8 sps:$4 sm:$0xff]  }
 0x1cf   :  { %v887_v9 = vmul.f32 0.7978846, %v886_v4  ;;  %1415 = vmatpush2.bf16.msra.mxu1 %v2046_v41 }
 0x1d0   :  { %1416 = vmatprep.subr.bf16.mxu1 %v2051_v40 }
 0x1d1   :  { %2070 = vtanh.f32 %v887_v9 }
 0x1d3   :  { %1417 = vmatpush2.bf16.msra.mxu1 %v2049_v42  ;;  %v1226_v42 = vld [vmem:[%s2508_s10] sm:$0x3] }
 0x1d4   :  { %1418 = vmatprep.subr.bf16.mxu1 %v2054_v43  ;;  %v1231_v43 = vrot.slane %v1226_v42, %v2397_v3 }
 0x1d7   :  { %1419 = vmatpush2.bf16.msra.mxu1 %v2052_v44 }
 0x1de   :  { %v2071_v22 = vpop.eup %2070 }
 0x1df   :  { %v889_v24 = vadd.f32 1.0, %v2071_v22 }
 0x1e1   :  { %v890_v35 = vmul.f32 %v889_v24, %v882_v23 }
 0x1e3   :  { %v908_v29 = vpack.c.bf16 %v890_v35, %v2269_v17 }
 0x1e5   :  { %1145 = vmatprep.mubr.bf16.mxu0 %v908_v29 }
 0x1e6   :  { %1146 = vmatmul.mubr.bf16.vlgmr.msra.gmra.mxu0 %v907_v20 }
 0x1e7   :  { %1904 = vmatprep.mubr.msk.bf16.mxu0 %vm2270_vm0, %v2269_v17  ;;  %v2057_v17 = vld [vmem:[#allocation13 + $0xc4] ss:$8 sps:$4 sm:$0xff]  }
 0x1e8   :  { %1420 = vmatprep.subr.bf16.mxu1 %v2057_v17 }
 0x1e9   :  { %1421 = vmatpush2.bf16.msra.mxu1 %v2055_v45 }
 0x1ea   :  { %1422 = vmatprep.subr.bf16.mxu1 %v2060_v46 }
 0x1ed   :  { %1423 = vmatpush2.bf16.msra.mxu1 %v2058_v47  ;;  %v1235_v47 = vrot.slane %v1226_v42, %v2394_v2 }
 0x1ee   :  { %1424 = vmatprep.subr.bf16.mxu1 %v2063_v48 }
 0x1f1   :  { %1425 = vmatpush2.bf16.msra.mxu1 %v2061_v49 }
 0x1f2   :  { %1426 = vmatprep.subr.bf16.mxu1 %v2066_v50 }
 0x1f5   :  { %1427 = vmatpush2.bf16.msra.mxu1 %v2064_v51 }
 0x1f6   :  { %1428 = vmatprep.subr.bf16.mxu1 %v2069_v52 }
 0x1f9   :  { %1429 = vmatpush2.bf16.msra.mxu1 %v2067_v53 }
 0x2a6   :  { %v1147_v57 = vpop.f32.mrf.mxu0 }
 0x2a7   :  { %v1148_v58 = vadd.f32 %v1147_v57, %v946_v55 }
 0x2a8   :  { %v1149_v59 = vpop.f32.mrf.mxu0 }
 0x2a9   :  { %v1160_v60 = vmul.f32 0.044715, %v1148_v58  ;;  %v1150_v61 = vadd.f32 %v1149_v59, %v950_v56  ;;  %v1156_v36 = vmul.f32 0.5, %v1148_v58 }
 0x2aa   :  { %v1151_v62 = vpop.f32.mrf.mxu0 }
 0x2ab   :  { %v1164_v63 = vmul.f32 %v1160_v60, %v1148_v58  ;;  %v1161_v0 = vmul.f32 0.044715, %v1150_v61  ;;  %v1152_v1 = vadd.f32 %v1151_v62, %v946_v55  ;;  %v1157_v27 = vmul.f32 0.5, %v1150_v61 }
 0x2ac   :  { %v1153_v4 = vpop.f32.mrf.mxu0 }
 0x2ad   :  { %v1165_v5 = vmul.f32 %v1161_v0, %v1150_v61  ;;  %v1162_v6 = vmul.f32 0.044715, %v1152_v1  ;;  %v1154_v7 = vadd.f32 %v1153_v4, %v950_v56  ;;  %v1168_v8 = vmul.f32 %v1164_v63, %v1148_v58 }
 0x2ae   :  { %v1158_v24 = vmul.f32 0.5, %v1152_v1 }
 0x2af   :  { %v1169_v9 = vmul.f32 %v1165_v5, %v1150_v61  ;;  %v1166_v10 = vmul.f32 %v1162_v6, %v1152_v1  ;;  %v1163_v11 = vmul.f32 0.044715, %v1154_v7  ;;  %v1172_v12 = vadd.f32 %v1168_v8, %v1148_v58  ;;  %v1806_v5 = vld [vmem:[%s2512_s14] ss:$0 sm:$0xff] }
 0x2b0   :  { %v1159_v29 = vmul.f32 0.5, %v1154_v7  ;;  %v1803_v8 = vld [vmem:[%s2509_s11] ss:$0 sm:$0xff] }
 0x2b1   :  { %v1170_v13 = vmul.f32 %v1166_v10, %v1152_v1  ;;  %v1167_v14 = vmul.f32 %v1163_v11, %v1154_v7  ;;  %v1173_v15 = vadd.f32 %v1169_v9, %v1150_v61  ;;  %v1176_v16 = vmul.f32 0.7978846, %v1172_v12  ;;  %v1804_v11 = vld [vmem:[%s2510_s12] ss:$0 sm:$0xff] }
 0x2b3   :  { %v1174_v18 = vadd.f32 %v1170_v13, %v1152_v1  ;;  %v1171_v19 = vmul.f32 %v1167_v14, %v1154_v7  ;;  %v1177_v25 = vmul.f32 0.7978846, %v1173_v15  ;;  %v1805_v1 = vld [vmem:[%s2511_s13] ss:$0 sm:$0xff] }
 0x2b5   :  { %v1178_v26 = vmul.f32 0.7978846, %v1174_v18  ;;  %v1175_v28 = vadd.f32 %v1171_v19, %v1154_v7  ;;  %2072 = vtanh.f32 %v1177_v25 }
 0x2b6   :  { %2074 = vtanh.f32 %v1176_v16 }
 0x2b7   :  { %2076 = vtanh.f32 %v1178_v26  ;;  %v1179_v30 = vmul.f32 0.7978846, %v1175_v28 }
 0x2b9   :  { %2078 = vtanh.f32 %v1179_v30 }
 0x2c2   :  { %v2073_v31 = vpop.eup %2072 }
 0x2c3   :  { %v2075_v32 = vpop.eup %2074  ;;  %v1185_v22 = vadd.f32 1.0, %v2073_v31 }
 0x2c4   :  { %v2077_v21 = vpop.eup %2076  ;;  %v1184_v35 = vadd.f32 1.0, %v2075_v32 }
 0x2c5   :  { %v1186_v33 = vadd.f32 1.0, %v2077_v21  ;;  %v1189_v37 = vmul.f32 %v1185_v22, %v1157_v27 }
 0x2c6   :  { %v2079_v23 = vpop.eup %2078  ;;  %v1188_v39 = vmul.f32 %v1184_v35, %v1156_v36 }
 0x2c7   :  { %v1187_v20 = vadd.f32 1.0, %v2079_v23  ;;  %v1190_v34 = vmul.f32 %v1186_v33, %v1158_v24 }
 0x2c9   :  { %v1191_v38 = vmul.f32 %v1187_v20, %v1159_v29  ;;  %v1192_v40 = vpack.c.bf16 %v1190_v34, %v1188_v39 }
 0x2cb   :  { %v1193_v41 = vpack.c.bf16 %v1191_v38, %v1189_v37 }
 0x2cd   :  { %1430 = vmatprep.mubr.bf16.mxu1 %v1193_v41 }
 0x2ce   :  { %1431 = vmatmul.mubr.bf16.vlgmr.msra.gmra.mxu1 %v1192_v40 }
 0x38e   :  { %v1432_v44 = vpop.f32.mrf.mxu1 }
 0x38f   :  { %v1433_v17 = vadd.f32 %v1432_v44, %v1231_v43 }
 0x390   :  { %v1434_v45 = vpop.f32.mrf.mxu1 }
 0x391   :  { %v1439_v46 = vadd.f32 %v1433_v17, %v1148_v58 }
 0x392   :  { %v1435_v48 = vpop.f32.mrf.mxu1 }
 0x393   :  { %1443 = vadd.xlane.f32.xlu1 %v1439_v46 }
 0x394   :  { %v1436_v49 = vpop.f32.mrf.mxu1 }
 0x395   :  { %v1437_v50 = vadd.f32 %v1436_v49, %v1235_v47 }
 0x397   :  { %v1440_v51 = vadd.f32 %v1437_v50, %v1154_v7 }
 0x399   :  { %1471 = vadd.xlane.f32.xlu0 %v1440_v51 }
 0x41c   :  { %v1444_v52 = vpop.xlane.xlu1 %1443 }
 0x41d   :  { %v1446_v54 = vmul.f32 0.0078125, %v1444_v52 }
 0x41f   :  { %v1447_v57 = vsub.f32 %v1439_v46, %v1446_v54 }
 0x421   :  { %v1448_v3 = vmul.f32 %v1447_v57, %v1447_v57 }
 0x422   :  { %v1472_v53 = vpop.xlane.xlu0 %1471 }
 0x423   :  { %v1473_v55 = vmul.f32 0.0078125, %v1472_v53 }
 0x425   :  { %v1474_v56 = vsub.f32 %v1440_v51, %v1473_v55 }
 0x427   :  { %v1475_v59 = vmul.f32 %v1474_v56, %v1474_v56 }
 0x429   :  { %1476 = vadd.xlane.f32.xlu0 %v1475_v59 }
 0x42d   :  { %1449 = vadd.xlane.f32.xlu0 %v1448_v3 }
 0x4b2   :  { %v1477_v60 = vpop.xlane.xlu0 %1476 }
 0x4b3   :  { %v1478_v58 = vmul.f32 0.0078125, %v1477_v60 }
 0x4b5   :  { %v1479_v61 = vadd.f32 1e-05, %v1478_v58 }
 0x4b6   :  { %v1450_v2 = vpop.xlane.xlu0 %1449 }
 0x4b7   :  { %2080 = vrsqrt.f32 %v1479_v61  ;;  %v1451_v62 = vmul.f32 0.0078125, %v1450_v2 }
 0x4b9   :  { %v1452_v63 = vadd.f32 1e-05, %v1451_v62 }
 0x4bb   :  { %2082 = vrsqrt.f32 %v1452_v63 }
 0x4c4   :  { %v2081_v0 = vpop.eup %2080 }
 0x4c5   :  { %v1481_v4 = vmul.f32 %v2081_v0, %v1474_v56 }
 0x4c7   :  { %v1488_v6 = vmul.f32 %v1805_v1, %v1481_v4 }
 0x4c8   :  { %v2083_v7 = vpop.eup %2082 }
 0x4c9   :  { %v1495_v9 = vadd.f32 %v1806_v5, %v1488_v6  ;;  %v1454_v10 = vmul.f32 %v2083_v7, %v1447_v57 }
 0x4cb   :  { %v1502_v12 = vmul.f32 %v1495_v9, %v1495_v9  ;;  %v1461_v13 = vmul.f32 %v1803_v8, %v1454_v10 }
 0x4cd   :  { %1503 = vadd.xlane.f32.xlu1 %v1502_v12  ;;  %v1468_v14 = vadd.f32 %v1804_v11, %v1461_v13 }
 0x4cf   :  { %v1496_v15 = vmul.f32 %v1468_v14, %v1468_v14 }
 0x4d1   :  { %1497 = vadd.xlane.f32.xlu0 %v1496_v15 }
 0x556   :  { %v1504_v16 = vpop.xlane.xlu1 %1503 }
 0x557   :  { %v1505_v18 = vadd.f32 1e-12, %v1504_v16 }
 0x559   :  { %2084 = vrsqrt.f32 %v1505_v18 }
 0x55a   :  { %v1498_v19 = vpop.xlane.xlu0 %1497 }
 0x55b   :  { %v1499_v25 = vadd.f32 1e-12, %v1498_v19 }
 0x55d   :  { %2086 = vrsqrt.f32 %v1499_v25 }
 0x566   :  { %v2085_v26 = vpop.eup %2084 }
 0x567   :  { %v1507_v28 = vmul.f32 %v2085_v26, %v1495_v9 }
 0x569   :  { %v1508_v30 = vpack.c.bf16 %v1507_v28, %v1507_v28 }
 0x56a   :  { %v2087_v31 = vpop.eup %2086 }
 0x56b   :  { %1564 = vmatprep.subr.bf16.mxu1 %v1508_v30  ;;  %v1501_v32 = vmul.f32 %v2087_v31, %v1468_v14 }
 0x56d   :  { %v1509_v21 = vpack.c.bf16 %v1501_v32, %v1501_v32 }
 0x56f   :  { %1903 = vmatpush3.bf16.xpose.msra.mxu0 %v1509_v21  ;;  %1565 = vmatpush1.bf16.xpose.msra.mxu1 %v1509_v21 }
 0x570   :  { %1582 = vmatprep.mubr.bf16.mxu1 %v1509_v21 }
 0x576   :  { %1905 = vmatmul.mubr.bf16.vlgmr.msra.gmra.mxu0 %v1508_v30  ;;  %1583 = vmatmul.mubr.bf16.vlgmr.msra.gmra.mxu1 %v1508_v30 }
 0x636   :  { %v1544_v22 = vpop.f32.mrf.mxu0  ;;  %v1584_v33 = vpop.f32.mrf.mxu1 }
 0x637   :  { %v1590_v23 = vmul.f32 0.5, %v1584_v33  ;;  %v1603_v24 = vsel %vm1591_vm8, %v1544_v22, -inf }
 0x638   :  { %v1586_v35 = vpop.f32.mrf.mxu1  ;;  %1604 = vmax.xlane.f32.xlu1 %v1603_v24  ;;  %v1906_v27 = vpop.f32.mrf.mxu0  ;;  %v1620_v47 = vrot.slane %v1603_v24, 4 }
 0x639   :  { %v1592_v29 = vsel %vm1591_vm8, %v1590_v23, -inf }
 0x63a   :  { %1593 = vmax.xlane.f32.xlu0 %v1592_v29  ;;  %v1547_v20 = vpop.f32.mrf.mxu0  ;;  %v1587_v36 = vpop.f32.mrf.mxu1  ;;  %v1621_v48 = vmax.f32 %v1603_v24, %v1620_v47 }
 0x63c   :  { %v1907_v34 = vpop.f32.mrf.mxu0  ;;  %v1588_v37 = vpop.f32.mrf.mxu1  ;;  %v1622_v49 = vrot.slane %v1621_v48, 2 }
 0x63e   :  { %v1623_v50 = vmax.f32 %v1621_v48, %v1622_v49 }
 0x640   :  { %v1624_v51 = vrot.slane %v1623_v50, 1 }
 0x642   :  { %v1625_v52 = vmax.f32 %v1623_v50, %v1624_v51 }
 0x644   :  { %v1626_v53 = vsub.f32 %v1544_v22, %v1625_v52 }
 0x646   :  { %v1627_v54 = vmul.f32 1.442695, %v1626_v53 }
 0x6c1   :  { %v1605_v38 = vpop.xlane.xlu1 %1604 }
 0x6c2   :  { %v1606_v39 = vsub.f32 %v1544_v22, %v1605_v38 }
 0x6c3   :  { %v1594_v41 = vpop.xlane.xlu0 %1593 }
 0x6c4   :  { %v1607_v40 = vmul.f32 1.442695, %v1606_v39  ;;  %v1595_v42 = vsub.f32 %v1590_v23, %v1594_v41 }
 0x6c6   :  { %2088 = vpow2.f32 %v1607_v40  ;;  %v1596_v43 = vmul.f32 1.442695, %v1595_v42 }
 0x6c8   :  { %2090 = vpow2.f32 %v1596_v43 }
 0x6c9   :  { %2092 = vpow2.f32 %v1627_v54 }
 0x6d3   :  { %v2089_v44 = vpop.eup %2088 }
 0x6d4   :  { %v1609_v17 = vsel %vm1591_vm8, %v2089_v44, 0.0 }
 0x6d5   :  { %v2091_v45 = vpop.eup %2090  ;;  %1610 = vadd.xlane.f32.xlu1 %v1609_v17 }
 0x6d6   :  { %v1598_v46 = vsel %vm1591_vm8, %v2091_v45, 0.0  ;;  %v2093_v55 = vpop.eup %2092 }
 0x6d7   :  { %1599 = vadd.xlane.f32.xlu0 %v1598_v46  ;;  %v1629_v56 = vsel %vm1591_vm8, %v2093_v55, 0.0 }
 0x6d8   :  { %v1630_v57 = vrot.slane %v1629_v56, 4 }
 0x6da   :  { %v1631_v59 = vadd.f32 %v1630_v57, %v1629_v56 }
 0x6dc   :  { %v1632_v3 = vrot.slane %v1631_v59, 2 }
 0x6de   :  { %v1633_v60 = vadd.f32 %v1632_v3, %v1631_v59 }
 0x6e0   :  { %v1634_v58 = vrot.slane %v1633_v60, 1 }
 0x6e2   :  { %v1635_v61 = vadd.f32 %v1634_v58, %v1633_v60 }
 0x6e4   :  { %2094 = vlog2.f32 %v1635_v61 }
 0x6f1   :  { %v2095_v63 = vpop.eup %2094 }
 0x6f2   :  { %v1637_v0 = vmul.f32 0.6931472, %v2095_v63 }
 0x6f4   :  { %v1638_v8 = vsub.f32 %v1626_v53, %v1637_v0 }
 0x75e   :  { %v1611_v2 = vpop.xlane.xlu1 %1610 }
 0x75f   :  { %2096 = vlog2.f32 %v1611_v2 }
 0x760   :  { %v1600_v62 = vpop.xlane.xlu0 %1599 }
 0x761   :  { %2098 = vrcp.f32 %v1600_v62 }
 0x76c   :  { %v2097_v1 = vpop.eup %2096 }
 0x76d   :  { %v1613_v4 = vmul.f32 0.6931472, %v2097_v1 }
 0x76e   :  { %v2099_v5 = vpop.eup %2098 }
 0x76f   :  { %v1602_v6 = vmul.f32 %v2099_v5, %v2091_v45  ;;  %v1614_v7 = vsub.f32 %v1606_v39, %v1613_v4 }
 0x771   :  { %v1615_v9 = vmul.f32 %v1614_v7, %v1602_v6  ;;  %v1639_v10 = vmul.f32 %v1638_v8, %v1602_v6 }
 0x773   :  { %v1616_v11 = vsel %vm1591_vm8, %v1615_v9, 0.0  ;;  %v1640_v12 = vsel %vm1591_vm8, %v1639_v10, 0.0 }
 0x774   :  { %1617 = vadd.xlane.f32.xlu1 %v1616_v11  ;;  %v1641_v13 = vrot.slane %v1640_v12, 4 }
 0x776   :  { %v1642_v14 = vadd.f32 %v1641_v13, %v1640_v12 }
 0x778   :  { %v1643_v15 = vrot.slane %v1642_v14, 2 }
 0x77a   :  { %v1644_v16 = vadd.f32 %v1643_v15, %v1642_v14 }
 0x77c   :  { %v1645_v18 = vrot.slane %v1644_v16, 1 }
 0x77e   :  { %v1646_v19 = vadd.f32 %v1645_v18, %v1644_v16 }
 0x780   :  { %v1647_v25 = vsub.f32 0.0, %v1646_v19 }
 0x782   :  { %v1663_v26 = vsel %vm1662_vm9, %v1647_v25, 0.0 }
 0x783   :  { %1664 = vadd.xlane.f32.xlu1 %v1663_v26 }
 0x7fd   :  { %v1618_v28 = vpop.xlane.xlu1 %1617 }
 0x7fe   :  { %v1619_v30 = vsub.f32 0.0, %v1618_v28 }
 0x800   :  { %v1649_v31 = vsel %vm1648_vm10, %v1619_v30, 0.0 }
 0x801   :  { %1650 = vadd.xlane.f32.xlu0 %v1649_v31 }
 0x80c   :  { %v1665_v32 = vpop.xlane.xlu1 %1664 }
 0x80d   :  { %v1666_v21 = vrot.slane %v1665_v32, 4 }
 0x80f   :  { %v1667_v22 = vadd.f32 %v1666_v21, %v1665_v32 }
 0x811   :  { %v1668_v33 = vrot.slane %v1667_v22, 2 }
 0x813   :  { %v1669_v27 = vadd.f32 %v1668_v33, %v1667_v22 }
 0x815   :  { %v1670_v36 = vrot.slane %v1669_v27, 1 }
 0x817   :  { %v1671_v38 = vadd.f32 %v1670_v36, %v1669_v27 }
 0x88a   :  { %v1651_v23 = vpop.xlane.xlu0 %1650 }
 0x88b   :  { %v1652_v24 = vrot.slane %v1651_v23, 4 }
 0x88d   :  { %v1653_v35 = vadd.f32 %v1652_v24, %v1651_v23 }
 0x88f   :  { %v1654_v29 = vrot.slane %v1653_v35, 2 }
 0x891   :  { %v1655_v20 = vadd.f32 %v1654_v29, %v1653_v35 }
 0x893   :  { %v1656_v34 = vrot.slane %v1655_v20, 1 }
 0x895   :  { %v1657_v37 = vadd.f32 %v1656_v34, %v1655_v20 }
 0x897   :  { %1908 = vpush %v1657_v37 }
 0x898   :  { %1910 = vpush %v1671_v38 }
 0x8c8   :  { %s1909_s11 = spop %1908 }
 0x8c9   :  { %s1661_s12 = smul.f32 0.125, %s1909_s11  ;;  %s1911_s13 = spop %1910 }
 0x8ca   :  { %s1675_s14 = smul.f32 0.125, %s1911_s13 }
 0x8cc   :  { %s1676_s16 = sadd.f32 %s1675_s14, %s1661_s12 }
 0x8ce   :  { %s1677_s17 = smul.f32 0.5, %s1676_s16 }
 0x8d0   :  { %1679 = sst [smem:[#allocation14]] %s1677_s17 }
 0x8d1   :  { %1687 = dma.smem_to_hbm %s2271_s0, 16, %s2513_s15, [#allocation4]  }
 0x8d2   :  { %2256 = dma.done.wait [#allocation4], 16  }
 0x8d3   :  { %2257 = vsyncadd [#allocation4], 4294967280 }
 0x8d4   :  { %1691 = sfence }
 0x8d5   :  { %1692 = vsyncpa [#allocation3], 1 }
 0x8d6   :  { %1693 = vsyncpa [#allocation6], 1 }
 0x8d7   :  { %1694 = vsyncpa [#allocation9], 1 }
 0x8d8   :  { %1695 = vsyncpa [#allocation12], 1 }
 0x8d9   :  { %1696 = vsyncpa [#allocation4], 1 }

</bundles_post_ra>
